<compile_context>
chip_gen: v7x
topology: tpu7x:2x2x1
jax: 0.10.0
libtpu: 0.0.40
codegen_flags: <defaults>
</compile_context>

<pallas_src>
import math
import functools

import jax
import jax.numpy as jnp
from jax.experimental import pallas as pl
from jax.experimental.pallas import tpu as pltpu

LN_EPS = 1e-5              # torch.nn.LayerNorm default eps
NEG_INF = -1e30            # finite mask sentinel (no -inf NaN risk)


def _layernorm(x, gamma, beta):
    x = x.astype(jnp.float32)
    mu = jnp.mean(x, axis=-1, keepdims=True)
    var = jnp.mean((x - mu) ** 2, axis=-1, keepdims=True)
    return (x - mu) * jax.lax.rsqrt(var + LN_EPS) * gamma + beta


def _gelu_exact(x):
    # torch.nn.GELU default = exact (erf) formulation
    return 0.5 * x * (1.0 + jax.lax.erf(x * (1.0 / math.sqrt(2.0))))


def _pick_tile(total, target, quantum):
    """Largest multiple of `quantum` dividing `total`, <= target (else full)."""
    if total <= target:
        return total
    t = (target // quantum) * quantum
    while t >= quantum:
        if total % t == 0:
            return t
        t -= quantum
    return total


def _hw_config():
    """Generation-specific VMEM limit + tile targets.

    v7x has only 64 MiB VMEM per TensorCore -> reserve headroom (~48 MiB) and
    use smaller tiles; v5e/v6e have 128 MiB physical -> raise the scoped limit
    well above their 16/32 MiB defaults and use larger tiles."""
    vmem_cap = 128 << 20
    if hasattr(pltpu, "get_tpu_info"):
        try:  # hardware query only; never used to hide kernel failures
            info = pltpu.get_tpu_info()
            vmem_cap = int(getattr(info, "vmem_capacity_bytes", vmem_cap) or vmem_cap)
        except Exception:
            pass
    if vmem_cap <= (64 << 20):          # v7x-class TensorCore
        return dict(vmem_limit=48 << 20, q_tile=128, v_tile=512, head_t_tile=256)
    return dict(vmem_limit=100 << 20, q_tile=256, v_tile=2048, head_t_tile=512)


@functools.lru_cache(maxsize=None)
def _supports_single_buffered_weights():
    """Explicit capability probe for pl.Buffered(buffer_count=1): one tiny,
    dedicated pallas_call evaluated once, instead of a blanket try/except
    around the real kernels (which would mask genuine bugs)."""
    if not hasattr(pl, "Buffered"):
        return False

    def _copy(x_ref, o_ref):
        o_ref[...] = x_ref[...]

    try:
        spec = pl.BlockSpec((8, 128), lambda i: (0, 0),
                            pipeline_mode=pl.Buffered(buffer_count=1))
        x = jnp.zeros((8, 128), jnp.float32)
        y = pl.pallas_call(
            _copy,
            out_shape=jax.ShapeDtypeStruct((8, 128), jnp.float32),
            grid=(1,),
            in_specs=[spec],
            out_specs=pl.BlockSpec((8, 128), lambda i: (0, 0)),
        )(x)
        jax.block_until_ready(y)
        return True
    except Exception:
        return False


# ----------------------------------------------------------------------------
# Fused transformer Block kernel; grid = (batch, query-tile)
# ----------------------------------------------------------------------------
def transformer_block_kernel(x_ref,
                             ln1_g_ref, ln1_b_ref,
                             wq_ref, bq_ref, wk_ref, bk_ref, wv_ref, bv_ref,
                             wo_ref, bo_ref,
                             ln2_g_ref, ln2_b_ref,
                             w1_ref, b1_ref, w2_ref, b2_ref,
                             out_ref, kh_ref, vh_ref, *, n_head, q_tile):
    T, E = x_ref.shape[1], x_ref.shape[2]
    H = n_head
    dh = E // H
    tT = q_tile
    cdt = jnp.bfloat16                       # MXU input dtype; accumulation f32
    t_idx = pl.program_id(1)

    # ---- K/V computed ONCE per (layer, batch): only at the first query tile,
    # stored head-major in VMEM scratch and reused by later query tiles
    # (t axis is "arbitrary" so the scratch persists in iteration order). ----
    @pl.when(t_idx == 0)
    def _():
        lnx = _layernorm(x_ref[0], ln1_g_ref[...], ln1_b_ref[...]).astype(cdt)
        k = (jnp.dot(lnx, wk_ref[...], preferred_element_type=jnp.float32)
             + bk_ref[...]).astype(cdt)
        v = (jnp.dot(lnx, wv_ref[...], preferred_element_type=jnp.float32)
             + bv_ref[...]).astype(cdt)
        kh_ref[...] = jnp.transpose(k.reshape(T, H, dh), (1, 0, 2))    # (H, T, dh)
        vh_ref[...] = jnp.transpose(v.reshape(T, H, dh), (1, 0, 2))

    # ---- queries / residual stream for this sequence tile ----
    q_start = pl.multiple_of(t_idx * tT, tT)
    x_q = x_ref[0, pl.ds(q_start, tT), :].astype(jnp.float32)          # (tT, E) f32
    lnq = _layernorm(x_q, ln1_g_ref[...], ln1_b_ref[...]).astype(cdt)
    q = jnp.dot(lnq, wq_ref[...], preferred_element_type=jnp.float32) + bq_ref[...]
    q = (q * (1.0 / math.sqrt(dh))).astype(cdt)       # fold 1/sqrt(d_k) into q
    qh = jnp.transpose(q.reshape(tT, H, dh), (1, 0, 2))                # (H, tT, dh)

    # ---- flash-style online softmax over causally bounded KV tiles ----
    def kv_update(carry, ks, bias):
        m, l, acc = carry
        kh = kh_ref[:, pl.ds(ks, tT), :]                               # (H, tT, dh)
        vh = vh_ref[:, pl.ds(ks, tT), :]
        s = jnp.einsum('hqd,hkd->hqk', qh, kh,
                       preferred_element_type=jnp.float32)             # (H, tT, tT)
        if bias is not None:
            s = s + bias                                               # bcast over H
        m_new = jnp.maximum(m, jnp.max(s, axis=-1, keepdims=True))
        a = jnp.exp(m - m_new)
        p = jnp.exp(s - m_new)
        l_new = a * l + jnp.sum(p, axis=-1, keepdims=True)
        acc_new = a * acc + jnp.einsum('hqk,hkd->hqd', p.astype(cdt), vh,
                                       preferred_element_type=jnp.float32)
        return (m_new, l_new, acc_new)

    init = (jnp.full((H, tT, 1), NEG_INF, jnp.float32),
            jnp.zeros((H, tT, 1), jnp.float32),
            jnp.zeros((H, tT, dh), jnp.float32))
    # KV tiles strictly below the diagonal: fully visible, no masking at all.
    carry = jax.lax.fori_loop(
        0, t_idx,
        lambda j, c: kv_update(c, pl.multiple_of(j * tT, tT), None),
        init)
    # Diagonal tile: 2-D additive causal bias (broadcasts over heads).
    row = jax.lax.broadcasted_iota(jnp.int32, (tT, tT), 0)
    col = jax.lax.broadcasted_iota(jnp.int32, (tT, tT), 1)
    diag_bias = jnp.where(col <= row, 0.0, NEG_INF).astype(jnp.float32)
    m, l, acc = kv_update(carry, q_start, diag_bias)

    o = acc * pl.reciprocal(l, approx=True)                            # (H, tT, dh)
    o = jnp.transpose(o, (1, 0, 2)).reshape(tT, E).astype(cdt)         # (tT, E)
    attn = jnp.dot(o, wo_ref[...], preferred_element_type=jnp.float32) + bo_ref[...]

    x1 = x_q + attn                                                    # residual 1

    # ---- ln_2 + GELU MLP ----
    ln2x = _layernorm(x1, ln2_g_ref[...], ln2_b_ref[...]).astype(cdt)
    h1 = jnp.dot(ln2x, w1_ref[...], preferred_element_type=jnp.float32) + b1_ref[...]
    h1 = _gelu_exact(h1).astype(cdt)
    h2 = jnp.dot(h1, w2_ref[...], preferred_element_type=jnp.float32) + b2_ref[...]
    out_ref[0] = (x1 + h2).astype(out_ref.dtype)                       # residual 2


def run_block(x, block_params, n_head, *, hw):
    B, T, E = x.shape
    H4 = 4 * E
    dh = E // n_head
    tT = _pick_tile(T, hw['q_tile'], 128)     # quantum 128: MXU / bf16 friendly
    nQ = T // tT

    single = _supports_single_buffered_weights()

    def const_spec(shape):
        # Constant-index weights are fetched once per grid; single-buffer them
        # (if supported) so they are not duplicated in VMEM.
        if single:
            return pl.BlockSpec(shape, lambda b, t: (0, 0),
                                pipeline_mode=pl.Buffered(buffer_count=1))
        return pl.BlockSpec(shape, lambda b, t: (0, 0))

    in_specs = [
        pl.BlockSpec((1, T, E), lambda b, t: (b, 0, 0)),    # x (full seq; KV @ t==0)
        const_spec((1, E)), const_spec((1, E)),             # ln_1 gamma/beta
        const_spec((E, E)), const_spec((1, E)),             # w_qs / b_qs
        const_spec((E, E)), const_spec((1, E)),             # w_ks / b_ks
        const_spec((E, E)), const_spec((1, E)),             # w_vs / b_vs
        const_spec((E, E)), const_spec((1, E)),             # fc / b_fc
        const_spec((1, E)), const_spec((1, E)),             # ln_2 gamma/beta
        const_spec((E, H4)), const_spec((1, H4)),           # mlp fc1
        const_spec((H4, E)), const_spec((1, E)),            # mlp fc2
    ]
    out_spec = pl.BlockSpec((1, tT, E), lambda b, t: (b, t, 0))

    flops = int(B * (24 * T * E * E + 2 * T * T * E))
    transc = int(B * (n_head * T * T // 2 + 5 * T * E))
    bytes_acc = int(2 * B * T * E * 4 + 12 * E * E * 2 + B * T * E * 2)

    kern = functools.partial(transformer_block_kernel, n_head=n_head, q_tile=tT)
    return pl.pallas_call(
        kern,
        out_shape=jax.ShapeDtypeStruct((B, T, E), x.dtype),
        grid=(B, nQ),
        in_specs=in_specs,
        out_specs=out_spec,
        scratch_shapes=[pltpu.VMEM((n_head, T, dh), jnp.bfloat16),     # K (head-major)
                        pltpu.VMEM((n_head, T, dh), jnp.bfloat16)],    # V (head-major)
        compiler_params=pltpu.CompilerParams(
            # b parallel (megacore); t arbitrary so the K/V scratch written at
            # t==0 stays valid for all later query tiles of the same batch row.
            dimension_semantics=("parallel", "arbitrary"),
            vmem_limit_bytes=hw['vmem_limit']),
        cost_estimate=pl.CostEstimate(flops=flops, transcendentals=transc,
                                      bytes_accessed=bytes_acc),
    )(x, *block_params)


# ----------------------------------------------------------------------------
# Final LayerNorm (own kernel, computed once per token) + LM head matmul
# tiled over (batch, vocab, seq) with seq innermost.
# ----------------------------------------------------------------------------
def ln_f_kernel(x_ref, g_ref, b_ref, o_ref):
    o_ref[0] = _layernorm(x_ref[0], g_ref[...], b_ref[...]).astype(o_ref.dtype)


def head_matmul_kernel(lnx_ref, w_ref, o_ref):
    o_ref[0] = jnp.dot(lnx_ref[0], w_ref[...],
                       preferred_element_type=jnp.float32).astype(o_ref.dtype)


def run_head(x, ln_g, ln_b, w_head, *, hw):
    B, T, E = x.shape
    V = w_head.shape[1]
    tT = _pick_tile(T, hw['head_t_tile'], 128)
    tV = _pick_tile(V, hw['v_tile'], 128)
    nT, nV = T // tT, V // tV

    single = _supports_single_buffered_weights()

    def const2(shape):
        if single:
            return pl.BlockSpec(shape, lambda b, t: (0, 0),
                                pipeline_mode=pl.Buffered(buffer_count=1))
        return pl.BlockSpec(shape, lambda b, t: (0, 0))

    # Final LayerNorm hoisted out of the vocab loop: exactly once per token.
    lnx = pl.pallas_call(
        ln_f_kernel,
        out_shape=jax.ShapeDtypeStruct((B, T, E), jnp.bfloat16),
        grid=(B, nT),
        in_specs=[pl.BlockSpec((1, tT, E), lambda b, t: (b, t, 0)),
                  const2((1, E)), const2((1, E))],
        out_specs=pl.BlockSpec((1, tT, E), lambda b, t: (b, t, 0)),
        compiler_params=pltpu.CompilerParams(
            dimension_semantics=("parallel", "parallel"),
            vmem_limit_bytes=hw['vmem_limit']),
    )(x, ln_g, ln_b)

    flops = int(2 * B * T * E * V)
    bytes_acc = int(B * T * E * 2 + E * V * 2 + B * T * V * 4)
    return pl.pallas_call(
        head_matmul_kernel,
        out_shape=jax.ShapeDtypeStruct((B, T, V), jnp.float32),
        # T innermost: each vocab weight tile is fetched once per (b, v) and the
        # (tT, tV) f32 output block stays small (fits v7x's 64 MiB VMEM budget).
        grid=(B, nV, nT),
        in_specs=[pl.BlockSpec((1, tT, E), lambda b, v, t: (b, t, 0)),
                  pl.BlockSpec((E, tV), lambda b, v, t: (0, v))],
        out_specs=pl.BlockSpec((1, tT, tV), lambda b, v, t: (b, t, v)),
        compiler_params=pltpu.CompilerParams(
            dimension_semantics=("parallel", "parallel", "parallel"),
            vmem_limit_bytes=hw['vmem_limit']),
        cost_estimate=pl.CostEstimate(flops=flops, transcendentals=0,
                                      bytes_accessed=bytes_acc),
    )(lnx, w_head)


# ----------------------------------------------------------------------------
# Parameters & forward pass
# ----------------------------------------------------------------------------
def init_params(key, config):
    E, V, H = config['n_embd'], config['n_vocab'], config['n_head']
    dk = E // H
    keys = iter(jax.random.split(key, 8 + 16 * config['n_layer']))
    bf = jnp.bfloat16

    def nrm(shape, std, dtype=jnp.float32):
        return (std * jax.random.normal(next(keys), shape)).astype(dtype)

    params = {
        'wte': nrm((V, E), 0.02),
        'wpe': nrm((config['block_size'], E), 0.02),
        'ln_f_g': jnp.ones((1, E), jnp.float32),
        'ln_f_b': jnp.zeros((1, E), jnp.float32),
        'lm_head': nrm((E, V), 0.02, bf),        # (in, out); no bias
        'blocks': [],
    }
    std_qkv = math.sqrt(2.0 / (E + dk))
    xavier = math.sqrt(2.0 / (E + E))
    for _ in range(config['n_layer']):
        bp = (
            jnp.ones((1, E), jnp.float32), jnp.zeros((1, E), jnp.float32),   # ln_1
            nrm((E, E), std_qkv, bf), nrm((1, E), 0.01),                     # w_qs
            nrm((E, E), std_qkv, bf), nrm((1, E), 0.01),                     # w_ks
            nrm((E, E), std_qkv, bf), nrm((1, E), 0.01),                     # w_vs
            nrm((E, E), xavier, bf),  nrm((1, E), 0.01),                     # fc
            jnp.ones((1, E), jnp.float32), jnp.zeros((1, E), jnp.float32),   # ln_2
            nrm((E, 4 * E), 0.02, bf), nrm((1, 4 * E), 0.01),                # mlp fc1
            nrm((4 * E, E), 0.02, bf), nrm((1, E), 0.01),                    # mlp fc2
        )
        params['blocks'].append(bp)
    return params


def gpt_forward(ids, params, config):
    hw = _hw_config()
    B, T = ids.shape
    mcl = config['max_context_length']
    assert mcl is None or T <= mcl
    # TODO(synk): calc_fourier_position_embeddings (max_context_length=None) is
    #             undefined in the reference module and not implemented here.
    assert config.get('n_latent_tokens') is None, "latent-token path not implemented"
    # Embedding gathers are plain-JAX glue; dropout is identity at inference.
    tok_emb = params['wte'][ids]                         # (B, T, E) f32
    pos_emb = params['wpe'][jnp.arange(T)][None]         # (1, T, E) f32
    x = (tok_emb + pos_emb).astype(jnp.float32)          # residual stream in f32
    # n_latent_tokens is None -> every block is full causal self-attention.
    for bp in params['blocks']:
        x = run_block(x, bp, config['n_head'], hw=hw)
    logits = run_head(x, params['ln_f_g'], params['ln_f_b'], params['lm_head'], hw=hw)
    return logits


if __name__ == "__main__":
    config = dict(
        n_vocab=64, n_embd=32, n_head=4, n_layer=2,
        block_size=16, max_context_length=16, n_latent_tokens=None,
        embd_pdrop=0.0, attn_pdrop=0.0, resid_pdrop=0.0,
    )
    key = jax.random.PRNGKey(0)
    k_ids, k_params = jax.random.split(key)
    ids = jax.random.randint(k_ids, (2, 8), 0, config['n_vocab'], dtype=jnp.int32)
    params = init_params(k_params, config)

    logits = gpt_forward(ids, params, config)
    jax.block_until_ready(logits)
    assert logits.shape == (2, 8, config['n_vocab'])
    assert bool(jnp.all(jnp.isfinite(logits)))
    print("KERNEL_OK")
</pallas_src>

<mosaic_0001>
module attributes {stable_mosaic.version = 11 : i64} {
  func.func @_copy(%arg0: i32, %arg1: memref<8x128xf32, #tpu.memory_space<vmem>>, %arg2: memref<8x128xf32, #tpu.memory_space<vmem>>) attributes {dimension_semantics = [#tpu.dimension_semantics<arbitrary>], iteration_bounds = array<i64: 1>, scalar_prefetch = 0 : i64, scratch_operands = 0 : i64, tpu.core_type = #tpu.core_type<tc>, window_params = [{pipeline_mode = #tpu.pipeline_mode<synchronous>, transform_indices = @transform_0, window_bounds = array<i64: 8, 128>}, {pipeline_mode = #tpu.pipeline_mode<synchronous>, transform_indices = @transform_1, window_bounds = array<i64: 8, 128>}]} {
    %c0 = arith.constant 0 : index
    %c0_0 = arith.constant 0 : index
    %0 = vector.load %arg1[%c0, %c0_0] : memref<8x128xf32, #tpu.memory_space<vmem>>, vector<8x128xf32>
    %c0_1 = arith.constant 0 : index
    %c0_2 = arith.constant 0 : index
    %1 = vector.load %arg2[%c0_1, %c0_2] : memref<8x128xf32, #tpu.memory_space<vmem>>, vector<8x128xf32>
    tpu.vector_store %arg2[%c0_1, %c0_2], %0 {strides = array<i32>} : memref<8x128xf32, #tpu.memory_space<vmem>>, vector<8x128xf32>,
    return
  }
  func.func @transform_0(%arg0: i32) -> (i32, i32) {
    %c0_i32 = arith.constant 0 : i32
    %c0_i32_0 = arith.constant 0 : i32
    %c0_i32_1 = arith.constant 0 : i32
    return %c0_i32, %c0_i32_0 : i32, i32
  }
  func.func @transform_1(%arg0: i32) -> (i32, i32) {
    %c0_i32 = arith.constant 0 : i32
    %c0_i32_0 = arith.constant 0 : i32
    %c0_i32_1 = arith.constant 0 : i32
    return %c0_i32, %c0_i32_0 : i32, i32
  }
}

module attributes {stable_mosaic.version = 11 : i64} {
  func.func @transformer_block_kernel(%arg0: i32, %arg1: i32, %arg2: memref<1x8x32xf32, #tpu.memory_space<vmem>>, %arg3: memref<1x32xf32, #tpu.memory_space<vmem>>, %arg4: memref<1x32xf32, #tpu.memory_space<vmem>>, %arg5: memref<32x32xbf16, #tpu.memory_space<vmem>>, %arg6: memref<1x32xf32, #tpu.memory_space<vmem>>, %arg7: memref<32x32xbf16, #tpu.memory_space<vmem>>, %arg8: memref<1x32xf32, #tpu.memory_space<vmem>>, %arg9: memref<32x32xbf16, #tpu.memory_space<vmem>>, %arg10: memref<1x32xf32, #tpu.memory_space<vmem>>, %arg11: memref<32x32xbf16, #tpu.memory_space<vmem>>, %arg12: memref<1x32xf32, #tpu.memory_space<vmem>>, %arg13: memref<1x32xf32, #tpu.memory_space<vmem>>, %arg14: memref<1x32xf32, #tpu.memory_space<vmem>>, %arg15: memref<32x128xbf16, #tpu.memory_space<vmem>>, %arg16: memref<1x128xf32, #tpu.memory_space<vmem>>, %arg17: memref<128x32xbf16, #tpu.memory_space<vmem>>, %arg18: memref<1x32xf32, #tpu.memory_space<vmem>>, %arg19: memref<1x8x32xf32, #tpu.memory_space<vmem>>, %arg20: memref<4x8x8xbf16, #tpu.memory_space<vmem>>, %arg21: memref<4x8x8xbf16, #tpu.memory_space<vmem>>) attributes {dimension_semantics = [#tpu.dimension_semantics<parallel>, #tpu.dimension_semantics<arbitrary>], iteration_bounds = array<i64: 2, 1>, scalar_prefetch = 0 : i64, scratch_operands = 2 : i64, tpu.core_type = #tpu.core_type<tc>, window_params = [{transform_indices = @transform_0, window_bounds = array<i64: 1, 8, 32>}, {pipeline_mode = #tpu.pipeline_mode<synchronous>, transform_indices = @transform_1, window_bounds = array<i64: 1, 32>}, {pipeline_mode = #tpu.pipeline_mode<synchronous>, transform_indices = @transform_2, window_bounds = array<i64: 1, 32>}, {pipeline_mode = #tpu.pipeline_mode<synchronous>, transform_indices = @transform_3, window_bounds = array<i64: 32, 32>}, {pipeline_mode = #tpu.pipeline_mode<synchronous>, transform_indices = @transform_4, window_bounds = array<i64: 1, 32>}, {pipeline_mode = #tpu.pipeline_mode<synchronous>, transform_indices = @transform_5, window_bounds = array<i64: 32, 32>}, {pipeline_mode = #tpu.pipeline_mode<synchronous>, transform_indices = @transform_6, window_bounds = array<i64: 1, 32>}, {pipeline_mode = #tpu.pipeline_mode<synchronous>, transform_indices = @transform_7, window_bounds = array<i64: 32, 32>}, {pipeline_mode = #tpu.pipeline_mode<synchronous>, transform_indices = @transform_8, window_bounds = array<i64: 1, 32>}, {pipeline_mode = #tpu.pipeline_mode<synchronous>, transform_indices = @transform_9, window_bounds = array<i64: 32, 32>}, {pipeline_mode = #tpu.pipeline_mode<synchronous>, transform_indices = @transform_10, window_bounds = array<i64: 1, 32>}, {pipeline_mode = #tpu.pipeline_mode<synchronous>, transform_indices = @transform_11, window_bounds = array<i64: 1, 32>}, {pipeline_mode = #tpu.pipeline_mode<synchronous>, transform_indices = @transform_12, window_bounds = array<i64: 1, 32>}, {pipeline_mode = #tpu.pipeline_mode<synchronous>, transform_indices = @transform_13, window_bounds = array<i64: 32, 128>}, {pipeline_mode = #tpu.pipeline_mode<synchronous>, transform_indices = @transform_14, window_bounds = array<i64: 1, 128>}, {pipeline_mode = #tpu.pipeline_mode<synchronous>, transform_indices = @transform_15, window_bounds = array<i64: 128, 32>}, {pipeline_mode = #tpu.pipeline_mode<synchronous>, transform_indices = @transform_16, window_bounds = array<i64: 1, 32>}, {transform_indices = @transform_17, window_bounds = array<i64: 1, 8, 32>}]} {
    %c0_i32 = arith.constant 0 : i32
    %0 = arith.cmpi eq, %arg1, %c0_i32 : i32
    %1 = arith.extui %0 : i1 to i32
    %c0_i32_0 = arith.constant 0 : i32
    %2 = arith.cmpi ne, %1, %c0_i32_0 : i32
    scf.if %2 {
      %c0_60 = arith.constant 0 : index
      %c0_61 = arith.constant 0 : index
      %c0_62 = arith.constant 0 : index
      %140 = vector.load %arg2[%c0_60, %c0_61, %c0_62] : memref<1x8x32xf32, #tpu.memory_space<vmem>>, vector<1x8x32xf32>
      %141 = vector.shape_cast %140 : vector<1x8x32xf32> to vector<8x32xf32>
      %c0_63 = arith.constant 0 : index
      %c0_64 = arith.constant 0 : index
      %142 = vector.load %arg3[%c0_63, %c0_64] : memref<1x32xf32, #tpu.memory_space<vmem>>, vector<1x32xf32>
      %c0_65 = arith.constant 0 : index
      %c0_66 = arith.constant 0 : index
      %143 = vector.load %arg4[%c0_65, %c0_66] : memref<1x32xf32, #tpu.memory_space<vmem>>, vector<1x32xf32>
      %cst_67 = arith.constant dense<0.000000e+00> : vector<8xf32>
      %144 = vector.multi_reduction <add>, %141, %cst_67 [1] : vector<8x32xf32> to vector<8xf32>
      %145 = vector.shape_cast %144 : vector<8xf32> to vector<8x1xf32>
      %cst_68 = arith.constant 3.200000e+01 : f32
      %146 = vector.broadcast %cst_68 : f32 to vector<8x1xf32>
      %147 = arith.divf %145, %146 : vector<8x1xf32>
      %148 = vector.broadcast %147 : vector<8x1xf32> to vector<8x32xf32>
      %149 = arith.subf %141, %148 : vector<8x32xf32>
      %150 = arith.mulf %149, %149 : vector<8x32xf32>
      %cst_69 = arith.constant dense<0.000000e+00> : vector<8xf32>
      %151 = vector.multi_reduction <add>, %150, %cst_69 [1] : vector<8x32xf32> to vector<8xf32>
      %152 = vector.shape_cast %151 : vector<8xf32> to vector<8x1xf32>
      %cst_70 = arith.constant 3.200000e+01 : f32
      %153 = vector.broadcast %cst_70 : f32 to vector<8x1xf32>
      %154 = arith.divf %152, %153 : vector<8x1xf32>
      %155 = vector.broadcast %147 : vector<8x1xf32> to vector<8x32xf32>
      %156 = arith.subf %141, %155 : vector<8x32xf32>
      %cst_71 = arith.constant 9.99999974E-6 : f32
      %157 = vector.broadcast %cst_71 : f32 to vector<8x1xf32>
      %158 = arith.addf %154, %157 : vector<8x1xf32>
      %159 = math.rsqrt %158 : vector<8x1xf32>
      %160 = vector.broadcast %159 : vector<8x1xf32> to vector<8x32xf32>
      %161 = arith.mulf %156, %160 : vector<8x32xf32>
      %162 = vector.broadcast %142 : vector<1x32xf32> to vector<8x32xf32>
      %163 = arith.mulf %161, %162 : vector<8x32xf32>
      %164 = vector.broadcast %143 : vector<1x32xf32> to vector<8x32xf32>
      %165 = arith.addf %163, %164 : vector<8x32xf32>
      %166 = arith.truncf %165 : vector<8x32xf32> to vector<8x32xbf16>
      %c0_72 = arith.constant 0 : index
      %c0_73 = arith.constant 0 : index
      %167 = vector.load %arg7[%c0_72, %c0_73] : memref<32x32xbf16, #tpu.memory_space<vmem>>, vector<32x32xbf16>
      %cst_74 = arith.constant dense<0.000000e+00> : vector<8x32xf32>
      %168 = tpu.matmul %166, %167, %cst_74 {dimension_numbers = #tpu.dot_dimension_numbers<[1], [0], [0], [1], [0, 0, 1, 1], [], []>} : vector<8x32xbf16>, vector<32x32xbf16>, vector<8x32xf32> -> vector<8x32xf32>
      %c0_75 = arith.constant 0 : index
      %c0_76 = arith.constant 0 : index
      %169 = vector.load %arg8[%c0_75, %c0_76] : memref<1x32xf32, #tpu.memory_space<vmem>>, vector<1x32xf32>
      %170 = vector.broadcast %169 : vector<1x32xf32> to vector<8x32xf32>
      %171 = arith.addf %168, %170 : vector<8x32xf32>
      %172 = arith.truncf %171 : vector<8x32xf32> to vector<8x32xbf16>
      %c0_77 = arith.constant 0 : index
      %c0_78 = arith.constant 0 : index
      %173 = vector.load %arg9[%c0_77, %c0_78] : memref<32x32xbf16, #tpu.memory_space<vmem>>, vector<32x32xbf16>
      %cst_79 = arith.constant dense<0.000000e+00> : vector<8x32xf32>
      %174 = tpu.matmul %166, %173, %cst_79 {dimension_numbers = #tpu.dot_dimension_numbers<[1], [0], [0], [1], [0, 0, 1, 1], [], []>} : vector<8x32xbf16>, vector<32x32xbf16>, vector<8x32xf32> -> vector<8x32xf32>
      %c0_80 = arith.constant 0 : index
      %c0_81 = arith.constant 0 : index
      %175 = vector.load %arg10[%c0_80, %c0_81] : memref<1x32xf32, #tpu.memory_space<vmem>>, vector<1x32xf32>
      %176 = vector.broadcast %175 : vector<1x32xf32> to vector<8x32xf32>
      %177 = arith.addf %174, %176 : vector<8x32xf32>
      %178 = arith.truncf %177 : vector<8x32xf32> to vector<8x32xbf16>
      %179 = vector.shape_cast %172 : vector<8x32xbf16> to vector<8x4x8xbf16>
      %180 = tpu.transpose %179, [1, 0, 2] : vector<8x4x8xbf16> -> vector<4x8x8xbf16>
      %c0_82 = arith.constant 0 : index
      %c0_83 = arith.constant 0 : index
      %c0_84 = arith.constant 0 : index
      %181 = vector.load %arg20[%c0_82, %c0_83, %c0_84] : memref<4x8x8xbf16, #tpu.memory_space<vmem>>, vector<4x8x8xbf16>
      tpu.vector_store %arg20[%c0_82, %c0_83, %c0_84], %180 {strides = array<i32>} : memref<4x8x8xbf16, #tpu.memory_space<vmem>>, vector<4x8x8xbf16>,
      %182 = vector.shape_cast %178 : vector<8x32xbf16> to vector<8x4x8xbf16>
      %183 = tpu.transpose %182, [1, 0, 2] : vector<8x4x8xbf16> -> vector<4x8x8xbf16>
      %c0_85 = arith.constant 0 : index
      %c0_86 = arith.constant 0 : index
      %c0_87 = arith.constant 0 : index
      %184 = vector.load %arg21[%c0_85, %c0_86, %c0_87] : memref<4x8x8xbf16, #tpu.memory_space<vmem>>, vector<4x8x8xbf16>
      tpu.vector_store %arg21[%c0_85, %c0_86, %c0_87], %183 {strides = array<i32>} : memref<4x8x8xbf16, #tpu.memory_space<vmem>>, vector<4x8x8xbf16>,
    } else {
    }
    %c8_i32 = arith.constant 8 : i32
    %3 = arith.muli %arg1, %c8_i32 : i32
    %4 = tpu.assume_multiple %3, 8 : i32
    %c0 = arith.constant 0 : index
    %5 = arith.index_cast %4 : i32 to index
    %c0_1 = arith.constant 0 : index
    %6 = vector.load %arg2[%c0, %5, %c0_1] : memref<1x8x32xf32, #tpu.memory_space<vmem>>, vector<1x8x32xf32>
    %7 = vector.shape_cast %6 : vector<1x8x32xf32> to vector<8x32xf32>
    %c0_2 = arith.constant 0 : index
    %c0_3 = arith.constant 0 : index
    %8 = vector.load %arg3[%c0_2, %c0_3] : memref<1x32xf32, #tpu.memory_space<vmem>>, vector<1x32xf32>
    %c0_4 = arith.constant 0 : index
    %c0_5 = arith.constant 0 : index
    %9 = vector.load %arg4[%c0_4, %c0_5] : memref<1x32xf32, #tpu.memory_space<vmem>>, vector<1x32xf32>
    %cst = arith.constant dense<0.000000e+00> : vector<8xf32>
    %10 = vector.multi_reduction <add>, %7, %cst [1] : vector<8x32xf32> to vector<8xf32>
    %11 = vector.shape_cast %10 : vector<8xf32> to vector<8x1xf32>
    %cst_6 = arith.constant 3.200000e+01 : f32
    %12 = vector.broadcast %cst_6 : f32 to vector<8x1xf32>
    %13 = arith.divf %11, %12 : vector<8x1xf32>
    %14 = vector.broadcast %13 : vector<8x1xf32> to vector<8x32xf32>
    %15 = arith.subf %7, %14 : vector<8x32xf32>
    %16 = arith.mulf %15, %15 : vector<8x32xf32>
    %cst_7 = arith.constant dense<0.000000e+00> : vector<8xf32>
    %17 = vector.multi_reduction <add>, %16, %cst_7 [1] : vector<8x32xf32> to vector<8xf32>
    %18 = vector.shape_cast %17 : vector<8xf32> to vector<8x1xf32>
    %cst_8 = arith.constant 3.200000e+01 : f32
    %19 = vector.broadcast %cst_8 : f32 to vector<8x1xf32>
    %20 = arith.divf %18, %19 : vector<8x1xf32>
    %21 = vector.broadcast %13 : vector<8x1xf32> to vector<8x32xf32>
    %22 = arith.subf %7, %21 : vector<8x32xf32>
    %cst_9 = arith.constant 9.99999974E-6 : f32
    %23 = vector.broadcast %cst_9 : f32 to vector<8x1xf32>
    %24 = arith.addf %20, %23 : vector<8x1xf32>
    %25 = math.rsqrt %24 : vector<8x1xf32>
    %26 = vector.broadcast %25 : vector<8x1xf32> to vector<8x32xf32>
    %27 = arith.mulf %22, %26 : vector<8x32xf32>
    %28 = vector.broadcast %8 : vector<1x32xf32> to vector<8x32xf32>
    %29 = arith.mulf %27, %28 : vector<8x32xf32>
    %30 = vector.broadcast %9 : vector<1x32xf32> to vector<8x32xf32>
    %31 = arith.addf %29, %30 : vector<8x32xf32>
    %32 = arith.truncf %31 : vector<8x32xf32> to vector<8x32xbf16>
    %c0_10 = arith.constant 0 : index
    %c0_11 = arith.constant 0 : index
    %33 = vector.load %arg5[%c0_10, %c0_11] : memref<32x32xbf16, #tpu.memory_space<vmem>>, vector<32x32xbf16>
    %cst_12 = arith.constant dense<0.000000e+00> : vector<8x32xf32>
    %34 = tpu.matmul %32, %33, %cst_12 {dimension_numbers = #tpu.dot_dimension_numbers<[1], [0], [0], [1], [0, 0, 1, 1], [], []>} : vector<8x32xbf16>, vector<32x32xbf16>, vector<8x32xf32> -> vector<8x32xf32>
    %c0_13 = arith.constant 0 : index
    %c0_14 = arith.constant 0 : index
    %35 = vector.load %arg6[%c0_13, %c0_14] : memref<1x32xf32, #tpu.memory_space<vmem>>, vector<1x32xf32>
    %36 = vector.broadcast %35 : vector<1x32xf32> to vector<8x32xf32>
    %37 = arith.addf %34, %36 : vector<8x32xf32>
    %cst_15 = arith.constant 0.353553385 : f32
    %38 = vector.broadcast %cst_15 : f32 to vector<8x32xf32>
    %39 = arith.mulf %37, %38 : vector<8x32xf32>
    %40 = arith.truncf %39 : vector<8x32xf32> to vector<8x32xbf16>
    %41 = vector.shape_cast %40 : vector<8x32xbf16> to vector<8x4x8xbf16>
    %42 = tpu.transpose %41, [1, 0, 2] : vector<8x4x8xbf16> -> vector<4x8x8xbf16>
    %cst_16 = arith.constant -1.000000e+30 : f32
    %43 = vector.broadcast %cst_16 : f32 to vector<4x8x1xf32>
    %cst_17 = arith.constant 0.000000e+00 : f32
    %44 = vector.broadcast %cst_17 : f32 to vector<4x8x1xf32>
    %cst_18 = arith.constant 0.000000e+00 : f32
    %45 = vector.broadcast %cst_18 : f32 to vector<4x8x8xf32>
    %c0_i32_19 = arith.constant 0 : i32
    %46 = arith.subi %arg1, %c0_i32_19 : i32
    %47 = arith.addi %c0_i32_19, %46 : i32
    %c1_i32 = arith.constant 1 : i32
    %48:3 = scf.for %arg22 = %c0_i32_19 to %47 step %c1_i32 iter_args(%arg23 = %43, %arg24 = %44, %arg25 = %45) -> (vector<4x8x1xf32>, vector<4x8x1xf32>, vector<4x8x8xf32>)  : i32 {
      %c8_i32_60 = arith.constant 8 : i32
      %140 = arith.muli %arg22, %c8_i32_60 : i32
      %141 = tpu.assume_multiple %140, 8 : i32
      %c0_61 = arith.constant 0 : index
      %142 = arith.index_cast %141 : i32 to index
      %c0_62 = arith.constant 0 : index
      %143 = vector.load %arg20[%c0_61, %142, %c0_62] : memref<4x8x8xbf16, #tpu.memory_space<vmem>>, vector<4x8x8xbf16>
      %c0_63 = arith.constant 0 : index
      %144 = arith.index_cast %141 : i32 to index
      %c0_64 = arith.constant 0 : index
      %145 = vector.load %arg21[%c0_63, %144, %c0_64] : memref<4x8x8xbf16, #tpu.memory_space<vmem>>, vector<4x8x8xbf16>
      "tpu.trace_start"() <{level = 10 : i32, message = "hqd,hkd->hqk"}> : () -> ()
      %cst_65 = arith.constant dense<0.000000e+00> : vector<4x8x8xf32>
      %146 = tpu.matmul %42, %143, %cst_65 {dimension_numbers = #tpu.dot_dimension_numbers<[2], [2], [1], [1], [0, 0, 0, 1, 1, 1], [0], [0]>} : vector<4x8x8xbf16>, vector<4x8x8xbf16>, vector<4x8x8xf32> -> vector<4x8x8xf32>
      "tpu.trace_stop"() : () -> ()
      %cst_66 = arith.constant dense<0xFF800000> : vector<4x8xf32>
      %147 = vector.multi_reduction <maximumf>, %146, %cst_66 [2] : vector<4x8x8xf32> to vector<4x8xf32>
      %148 = vector.shape_cast %147 : vector<4x8xf32> to vector<4x8x1xf32>
      %149 = arith.maximumf %arg23, %148 : vector<4x8x1xf32>
      %150 = arith.subf %arg23, %149 : vector<4x8x1xf32>
      %151 = math.exp %150 : vector<4x8x1xf32>
      %152 = vector.broadcast %149 : vector<4x8x1xf32> to vector<4x8x8xf32>
      %153 = arith.subf %146, %152 : vector<4x8x8xf32>
      %154 = math.exp %153 : vector<4x8x8xf32>
      %155 = arith.mulf %151, %arg24 : vector<4x8x1xf32>
      %cst_67 = arith.constant dense<0.000000e+00> : vector<4x8xf32>
      %156 = vector.multi_reduction <add>, %154, %cst_67 [2] : vector<4x8x8xf32> to vector<4x8xf32>
      %157 = vector.shape_cast %156 : vector<4x8xf32> to vector<4x8x1xf32>
      %158 = arith.addf %155, %157 : vector<4x8x1xf32>
      %159 = vector.broadcast %151 : vector<4x8x1xf32> to vector<4x8x8xf32>
      %160 = arith.mulf %159, %arg25 : vector<4x8x8xf32>
      %161 = arith.truncf %154 : vector<4x8x8xf32> to vector<4x8x8xbf16>
      "tpu.trace_start"() <{level = 10 : i32, message = "hqk,hkd->hqd"}> : () -> ()
      %cst_68 = arith.constant dense<0.000000e+00> : vector<4x8x8xf32>
      %162 = tpu.matmul %161, %145, %cst_68 {dimension_numbers = #tpu.dot_dimension_numbers<[2], [1], [1], [2], [0, 0, 0, 1, 1, 2], [0], [0]>} : vector<4x8x8xbf16>, vector<4x8x8xbf16>, vector<4x8x8xf32> -> vector<4x8x8xf32>
      "tpu.trace_stop"() : () -> ()
      %163 = arith.addf %160, %162 : vector<4x8x8xf32>
      scf.yield %149, %158, %163 : vector<4x8x1xf32>, vector<4x8x1xf32>, vector<4x8x8xf32>
    }
    %49 = tpu.iota {dimensions = array<i32: 0>} : vector<8x8xi32>
    %50 = tpu.iota {dimensions = array<i32: 1>} : vector<8x8xi32>
    %51 = arith.cmpi sle, %50, %49 : vector<8x8xi32>
    %cst_20 = arith.constant 0.000000e+00 : f32
    %cst_21 = arith.constant -1.000000e+30 : f32
    %52 = vector.broadcast %cst_20 : f32 to vector<8x8xf32>
    %53 = vector.broadcast %cst_21 : f32 to vector<8x8xf32>
    %54 = arith.select %51, %52, %53 : vector<8x8xi1>, vector<8x8xf32>
    %c0_22 = arith.constant 0 : index
    %55 = arith.index_cast %4 : i32 to index
    %c0_23 = arith.constant 0 : index
    %56 = vector.load %arg20[%c0_22, %55, %c0_23] : memref<4x8x8xbf16, #tpu.memory_space<vmem>>, vector<4x8x8xbf16>
    %c0_24 = arith.constant 0 : index
    %57 = arith.index_cast %4 : i32 to index
    %c0_25 = arith.constant 0 : index
    %58 = vector.load %arg21[%c0_24, %57, %c0_25] : memref<4x8x8xbf16, #tpu.memory_space<vmem>>, vector<4x8x8xbf16>
    "tpu.trace_start"() <{level = 10 : i32, message = "hqd,hkd->hqk"}> : () -> ()
    %cst_26 = arith.constant dense<0.000000e+00> : vector<4x8x8xf32>
    %59 = tpu.matmul %42, %56, %cst_26 {dimension_numbers = #tpu.dot_dimension_numbers<[2], [2], [1], [1], [0, 0, 0, 1, 1, 1], [0], [0]>} : vector<4x8x8xbf16>, vector<4x8x8xbf16>, vector<4x8x8xf32> -> vector<4x8x8xf32>
    "tpu.trace_stop"() : () -> ()
    %60 = vector.shape_cast %54 : vector<8x8xf32> to vector<1x8x8xf32>
    %61 = vector.broadcast %60 : vector<1x8x8xf32> to vector<4x8x8xf32>
    %62 = arith.addf %59, %61 : vector<4x8x8xf32>
    %cst_27 = arith.constant dense<0xFF800000> : vector<4x8xf32>
    %63 = vector.multi_reduction <maximumf>, %62, %cst_27 [2] : vector<4x8x8xf32> to vector<4x8xf32>
    %64 = vector.shape_cast %63 : vector<4x8xf32> to vector<4x8x1xf32>
    %65 = arith.maximumf %48#0, %64 : vector<4x8x1xf32>
    %66 = arith.subf %48#0, %65 : vector<4x8x1xf32>
    %67 = math.exp %66 : vector<4x8x1xf32>
    %68 = vector.broadcast %65 : vector<4x8x1xf32> to vector<4x8x8xf32>
    %69 = arith.subf %62, %68 : vector<4x8x8xf32>
    %70 = math.exp %69 : vector<4x8x8xf32>
    %71 = arith.mulf %67, %48#1 : vector<4x8x1xf32>
    %cst_28 = arith.constant dense<0.000000e+00> : vector<4x8xf32>
    %72 = vector.multi_reduction <add>, %70, %cst_28 [2] : vector<4x8x8xf32> to vector<4x8xf32>
    %73 = vector.shape_cast %72 : vector<4x8xf32> to vector<4x8x1xf32>
    %74 = arith.addf %71, %73 : vector<4x8x1xf32>
    %75 = vector.broadcast %67 : vector<4x8x1xf32> to vector<4x8x8xf32>
    %76 = arith.mulf %75, %48#2 : vector<4x8x8xf32>
    %77 = arith.truncf %70 : vector<4x8x8xf32> to vector<4x8x8xbf16>
    "tpu.trace_start"() <{level = 10 : i32, message = "hqk,hkd->hqd"}> : () -> ()
    %cst_29 = arith.constant dense<0.000000e+00> : vector<4x8x8xf32>
    %78 = tpu.matmul %77, %58, %cst_29 {dimension_numbers = #tpu.dot_dimension_numbers<[2], [1], [1], [2], [0, 0, 0, 1, 1, 2], [0], [0]>} : vector<4x8x8xbf16>, vector<4x8x8xbf16>, vector<4x8x8xf32> -> vector<4x8x8xf32>
    "tpu.trace_stop"() : () -> ()
    %79 = arith.addf %76, %78 : vector<4x8x8xf32>
    %80 = tpu.reciprocal %74 {approx = true} : vector<4x8x1xf32> -> vector<4x8x1xf32>
    %81 = vector.broadcast %80 : vector<4x8x1xf32> to vector<4x8x8xf32>
    %82 = arith.mulf %79, %81 : vector<4x8x8xf32>
    %83 = tpu.transpose %82, [1, 0, 2] : vector<4x8x8xf32> -> vector<8x4x8xf32>
    %84 = vector.shape_cast %83 : vector<8x4x8xf32> to vector<8x32xf32>
    %85 = arith.truncf %84 : vector<8x32xf32> to vector<8x32xbf16>
    %c0_30 = arith.constant 0 : index
    %c0_31 = arith.constant 0 : index
    %86 = vector.load %arg11[%c0_30, %c0_31] : memref<32x32xbf16, #tpu.memory_space<vmem>>, vector<32x32xbf16>
    %cst_32 = arith.constant dense<0.000000e+00> : vector<8x32xf32>
    %87 = tpu.matmul %85, %86, %cst_32 {dimension_numbers = #tpu.dot_dimension_numbers<[1], [0], [0], [1], [0, 0, 1, 1], [], []>} : vector<8x32xbf16>, vector<32x32xbf16>, vector<8x32xf32> -> vector<8x32xf32>
    %c0_33 = arith.constant 0 : index
    %c0_34 = arith.constant 0 : index
    %88 = vector.load %arg12[%c0_33, %c0_34] : memref<1x32xf32, #tpu.memory_space<vmem>>, vector<1x32xf32>
    %89 = vector.broadcast %88 : vector<1x32xf32> to vector<8x32xf32>
    %90 = arith.addf %87, %89 : vector<8x32xf32>
    %91 = arith.addf %7, %90 : vector<8x32xf32>
    %c0_35 = arith.constant 0 : index
    %c0_36 = arith.constant 0 : index
    %92 = vector.load %arg13[%c0_35, %c0_36] : memref<1x32xf32, #tpu.memory_space<vmem>>, vector<1x32xf32>
    %c0_37 = arith.constant 0 : index
    %c0_38 = arith.constant 0 : index
    %93 = vector.load %arg14[%c0_37, %c0_38] : memref<1x32xf32, #tpu.memory_space<vmem>>, vector<1x32xf32>
    %cst_39 = arith.constant dense<0.000000e+00> : vector<8xf32>
    %94 = vector.multi_reduction <add>, %91, %cst_39 [1] : vector<8x32xf32> to vector<8xf32>
    %95 = vector.shape_cast %94 : vector<8xf32> to vector<8x1xf32>
    %cst_40 = arith.constant 3.200000e+01 : f32
    %96 = vector.broadcast %cst_40 : f32 to vector<8x1xf32>
    %97 = arith.divf %95, %96 : vector<8x1xf32>
    %98 = vector.broadcast %97 : vector<8x1xf32> to vector<8x32xf32>
    %99 = arith.subf %91, %98 : vector<8x32xf32>
    %100 = arith.mulf %99, %99 : vector<8x32xf32>
    %cst_41 = arith.constant dense<0.000000e+00> : vector<8xf32>
    %101 = vector.multi_reduction <add>, %100, %cst_41 [1] : vector<8x32xf32> to vector<8xf32>
    %102 = vector.shape_cast %101 : vector<8xf32> to vector<8x1xf32>
    %cst_42 = arith.constant 3.200000e+01 : f32
    %103 = vector.broadcast %cst_42 : f32 to vector<8x1xf32>
    %104 = arith.divf %102, %103 : vector<8x1xf32>
    %105 = vector.broadcast %97 : vector<8x1xf32> to vector<8x32xf32>
    %106 = arith.subf %91, %105 : vector<8x32xf32>
    %cst_43 = arith.constant 9.99999974E-6 : f32
    %107 = vector.broadcast %cst_43 : f32 to vector<8x1xf32>
    %108 = arith.addf %104, %107 : vector<8x1xf32>
    %109 = math.rsqrt %108 : vector<8x1xf32>
    %110 = vector.broadcast %109 : vector<8x1xf32> to vector<8x32xf32>
    %111 = arith.mulf %106, %110 : vector<8x32xf32>
    %112 = vector.broadcast %92 : vector<1x32xf32> to vector<8x32xf32>
    %113 = arith.mulf %111, %112 : vector<8x32xf32>
    %114 = vector.broadcast %93 : vector<1x32xf32> to vector<8x32xf32>
    %115 = arith.addf %113, %114 : vector<8x32xf32>
    %116 = arith.truncf %115 : vector<8x32xf32> to vector<8x32xbf16>
    %c0_44 = arith.constant 0 : index
    %c0_45 = arith.constant 0 : index
    %117 = vector.load %arg15[%c0_44, %c0_45] : memref<32x128xbf16, #tpu.memory_space<vmem>>, vector<32x128xbf16>
    %cst_46 = arith.constant dense<0.000000e+00> : vector<8x128xf32>
    %118 = tpu.matmul %116, %117, %cst_46 {dimension_numbers = #tpu.dot_dimension_numbers<[1], [0], [0], [1], [0, 0, 1, 1], [], []>} : vector<8x32xbf16>, vector<32x128xbf16>, vector<8x128xf32> -> vector<8x128xf32>
    %c0_47 = arith.constant 0 : index
    %c0_48 = arith.constant 0 : index
    %119 = vector.load %arg16[%c0_47, %c0_48] : memref<1x128xf32, #tpu.memory_space<vmem>>, vector<1x128xf32>
    %120 = vector.broadcast %119 : vector<1x128xf32> to vector<8x128xf32>
    %121 = arith.addf %118, %120 : vector<8x128xf32>
    %cst_49 = arith.constant 5.000000e-01 : f32
    %122 = vector.broadcast %cst_49 : f32 to vector<8x128xf32>
    %123 = arith.mulf %122, %121 : vector<8x128xf32>
    %cst_50 = arith.constant 0.707106769 : f32
    %124 = vector.broadcast %cst_50 : f32 to vector<8x128xf32>
    %125 = arith.mulf %121, %124 : vector<8x128xf32>
    %126 = math.erf %125 : vector<8x128xf32>
    %cst_51 = arith.constant 1.000000e+00 : f32
    %127 = vector.broadcast %cst_51 : f32 to vector<8x128xf32>
    %128 = arith.addf %127, %126 : vector<8x128xf32>
    %129 = arith.mulf %123, %128 : vector<8x128xf32>
    %130 = arith.truncf %129 : vector<8x128xf32> to vector<8x128xbf16>
    %c0_52 = arith.constant 0 : index
    %c0_53 = arith.constant 0 : index
    %131 = vector.load %arg17[%c0_52, %c0_53] : memref<128x32xbf16, #tpu.memory_space<vmem>>, vector<128x32xbf16>
    %cst_54 = arith.constant dense<0.000000e+00> : vector<8x32xf32>
    %132 = tpu.matmul %130, %131, %cst_54 {dimension_numbers = #tpu.dot_dimension_numbers<[1], [0], [0], [1], [0, 0, 1, 1], [], []>} : vector<8x128xbf16>, vector<128x32xbf16>, vector<8x32xf32> -> vector<8x32xf32>
    %c0_55 = arith.constant 0 : index
    %c0_56 = arith.constant 0 : index
    %133 = vector.load %arg18[%c0_55, %c0_56] : memref<1x32xf32, #tpu.memory_space<vmem>>, vector<1x32xf32>
    %134 = vector.broadcast %133 : vector<1x32xf32> to vector<8x32xf32>
    %135 = arith.addf %132, %134 : vector<8x32xf32>
    %136 = arith.addf %91, %135 : vector<8x32xf32>
    %c0_57 = arith.constant 0 : index
    %c0_58 = arith.constant 0 : index
    %c0_59 = arith.constant 0 : index
    %137 = vector.load %arg19[%c0_57, %c0_58, %c0_59] : memref<1x8x32xf32, #tpu.memory_space<vmem>>, vector<1x8x32xf32>
    %138 = vector.shape_cast %137 : vector<1x8x32xf32> to vector<8x32xf32>
    %139 = vector.shape_cast %136 : vector<8x32xf32> to vector<1x8x32xf32>
    tpu.vector_store %arg19[%c0_57, %c0_58, %c0_59], %139 {strides = array<i32>} : memref<1x8x32xf32, #tpu.memory_space<vmem>>, vector<1x8x32xf32>,
    return
  }
  func.func @transform_0(%arg0: i32, %arg1: i32) -> (i32, i32, i32) {
    %c0_i32 = arith.constant 0 : i32
    %c0_i32_0 = arith.constant 0 : i32
    %c0_i32_1 = arith.constant 0 : i32
    return %arg0, %c0_i32, %c0_i32_0 : i32, i32, i32
  }
  func.func @transform_1(%arg0: i32, %arg1: i32) -> (i32, i32) {
    %c0_i32 = arith.constant 0 : i32
    %c0_i32_0 = arith.constant 0 : i32
    %c0_i32_1 = arith.constant 0 : i32
    return %c0_i32, %c0_i32_0 : i32, i32
  }
  func.func @transform_2(%arg0: i32, %arg1: i32) -> (i32, i32) {
    %c0_i32 = arith.constant 0 : i32
    %c0_i32_0 = arith.constant 0 : i32
    %c0_i32_1 = arith.constant 0 : i32
    return %c0_i32, %c0_i32_0 : i32, i32
  }
  func.func @transform_3(%arg0: i32, %arg1: i32) -> (i32, i32) {
    %c0_i32 = arith.constant 0 : i32
    %c0_i32_0 = arith.constant 0 : i32
    %c0_i32_1 = arith.constant 0 : i32
    return %c0_i32, %c0_i32_0 : i32, i32
  }
  func.func @transform_4(%arg0: i32, %arg1: i32) -> (i32, i32) {
    %c0_i32 = arith.constant 0 : i32
    %c0_i32_0 = arith.constant 0 : i32
    %c0_i32_1 = arith.constant 0 : i32
    return %c0_i32, %c0_i32_0 : i32, i32
  }
  func.func @transform_5(%arg0: i32, %arg1: i32) -> (i32, i32) {
    %c0_i32 = arith.constant 0 : i32
    %c0_i32_0 = arith.constant 0 : i32
    %c0_i32_1 = arith.constant 0 : i32
    return %c0_i32, %c0_i32_0 : i32, i32
  }
  func.func @transform_6(%arg0: i32, %arg1: i32) -> (i32, i32) {
    %c0_i32 = arith.constant 0 : i32
    %c0_i32_0 = arith.constant 0 : i32
    %c0_i32_1 = arith.constant 0 : i32
    return %c0_i32, %c0_i32_0 : i32, i32
  }
  func.func @transform_7(%arg0: i32, %arg1: i32) -> (i32, i32) {
    %c0_i32 = arith.constant 0 : i32
    %c0_i32_0 = arith.constant 0 : i32
    %c0_i32_1 = arith.constant 0 : i32
    return %c0_i32, %c0_i32_0 : i32, i32
  }
  func.func @transform_8(%arg0: i32, %arg1: i32) -> (i32, i32) {
    %c0_i32 = arith.constant 0 : i32
    %c0_i32_0 = arith.constant 0 : i32
    %c0_i32_1 = arith.constant 0 : i32
    return %c0_i32, %c0_i32_0 : i32, i32
  }
  func.func @transform_9(%arg0: i32, %arg1: i32) -> (i32, i32) {
    %c0_i32 = arith.constant 0 : i32
    %c0_i32_0 = arith.constant 0 : i32
    %c0_i32_1 = arith.constant 0 : i32
    return %c0_i32, %c0_i32_0 : i32, i32
  }
  func.func @transform_10(%arg0: i32, %arg1: i32) -> (i32, i32) {
    %c0_i32 = arith.constant 0 : i32
    %c0_i32_0 = arith.constant 0 : i32
    %c0_i32_1 = arith.constant 0 : i32
    return %c0_i32, %c0_i32_0 : i32, i32
  }
  func.func @transform_11(%arg0: i32, %arg1: i32) -> (i32, i32) {
    %c0_i32 = arith.constant 0 : i32
    %c0_i32_0 = arith.constant 0 : i32
    %c0_i32_1 = arith.constant 0 : i32
    return %c0_i32, %c0_i32_0 : i32, i32
  }
  func.func @transform_12(%arg0: i32, %arg1: i32) -> (i32, i32) {
    %c0_i32 = arith.constant 0 : i32
    %c0_i32_0 = arith.constant 0 : i32
    %c0_i32_1 = arith.constant 0 : i32
    return %c0_i32, %c0_i32_0 : i32, i32
  }
  func.func @transform_13(%arg0: i32, %arg1: i32) -> (i32, i32) {
    %c0_i32 = arith.constant 0 : i32
    %c0_i32_0 = arith.constant 0 : i32
    %c0_i32_1 = arith.constant 0 : i32
    return %c0_i32, %c0_i32_0 : i32, i32
  }
  func.func @transform_14(%arg0: i32, %arg1: i32) -> (i32, i32) {
    %c0_i32 = arith.constant 0 : i32
    %c0_i32_0 = arith.constant 0 : i32
    %c0_i32_1 = arith.constant 0 : i32
    return %c0_i32, %c0_i32_0 : i32, i32
  }
  func.func @transform_15(%arg0: i32, %arg1: i32) -> (i32, i32) {
    %c0_i32 = arith.constant 0 : i32
    %c0_i32_0 = arith.constant 0 : i32
    %c0_i32_1 = arith.constant 0 : i32
    return %c0_i32, %c0_i32_0 : i32, i32
  }
  func.func @transform_16(%arg0: i32, %arg1: i32) -> (i32, i32) {
    %c0_i32 = arith.constant 0 : i32
    %c0_i32_0 = arith.constant 0 : i32
    %c0_i32_1 = arith.constant 0 : i32
    return %c0_i32, %c0_i32_0 : i32, i32
  }
  func.func @transform_17(%arg0: i32, %arg1: i32) -> (i32, i32, i32) {
    %c0_i32 = arith.constant 0 : i32
    %c0_i32_0 = arith.constant 0 : i32
    return %arg0, %arg1, %c0_i32 : i32, i32, i32
  }
}

</mosaic_0001>

<bundles_post_ra>
// kernel: tpu_custom_call.1
= control target key start
LH: loop header
LB: loop body
LE: loop exit
PB: predicated region body
PF: predicated region fallthrough
CT: control target
= control target key end

     0   :  { %6 = vsyncpa [#allocation3], 0  ;;  %s124_s0 = inlined_call_operand.hbm [shape: f32[8,128], index: 0, kind: input, shape index: {}]   ;;  %s125_s1 = inlined_call_operand.hbm [shape: f32[8,128], index: 1, kind: output, shape index: {}]  }
   0x1   :  { %7 = vsyncpa [#allocation4], 0  ;;  %s88_s6 = smov [#allocation2]   ;;  %s40_s10 = scalar_lea.hbm %s124_s0, 128 }
   0x2   :  { %s14_s7 = sshll.u32 %s88_s6, 4  ;;  %p41_p0 = scmp.ne.s32.totalorder %s124_s0, %s40_s10  ;;  %s15_s7 = int_to_ptr.vmem [resolvable:$true] %s14_s7 }
   0x3   :  { %p44_p1 = scmp.lt.u32.totalorder %s40_s10, %s124_s0 }
   0x5   :  { %p46_p2 = pnand %p44_p1, %p41_p0 }
   0x7   :  { %49 = shalt.err (!%p46_p2)
}
   0x8   :  { %s50_s15 = scalar_lea.vmem %s15_s7, 128  ;;  %p55_p4 = scmp.lt.s32.totalorder %s15_s7, %s15_s7 }
   0x9   :  { %p51_p3 = scmp.ne.s32.totalorder %s15_s7, %s50_s15  ;;  %p56_p5 = scmp.lt.s32.totalorder %s50_s15, %s50_s15 }
   0xb   :  { %p57_p6 = por %p56_p5, %p55_p4 }
   0xd   :  { %p58_p7 = pnand %p57_p6, %p51_p3 }
   0xf   :  { %61 = shalt.err (!%p58_p7)
}
  0x10   :  { %17 = dma.hbm_to_vmem [thread:$0]  %s124_s0, 128, %s15_s7, [#allocation3]  }
  0x11   :  { %84 = dma.done.wait [#allocation3], 128  }
  0x12   :  { %85 = vsyncadd [#allocation3], 4294967168  ;;  %s89_s18 = smov [#allocation5]   ;;  %v21_v0 = vld [vmem:[#allocation2] sm:$0xff] }
  0x13   :  { %s29_s19 = sshll.u32 %s89_s18, 4  ;;  %22 = vst [vmem:[#allocation5] sm:$0xff] %v21_v0  ;;  %s30_s19 = int_to_ptr.vmem [resolvable:$true] %s29_s19 }
  0x14   :  { %s62_s20 = scalar_lea.vmem %s30_s19, 128  ;;  %p67_p9 = scmp.lt.s32.totalorder %s30_s19, %s30_s19 }
  0x15   :  { %p63_p8 = scmp.ne.s32.totalorder %s30_s19, %s62_s20  ;;  %p68_p10 = scmp.lt.s32.totalorder %s62_s20, %s62_s20 }
  0x17   :  { %p69_p11 = por %p68_p10, %p67_p9 }
  0x19   :  { %p70_p12 = pnand %p69_p11, %p63_p8 }
  0x1b   :  { %73 = shalt.err (!%p70_p12)
}
  0x1c   :  { %s74_s23 = scalar_lea.hbm %s125_s1, 128 }
  0x1d   :  { %p75_p13 = scmp.ne.s32.totalorder %s125_s1, %s74_s23  ;;  %p78_p0 = scmp.lt.u32.totalorder %s74_s23, %s125_s1 }
  0x1f   :  { %p80_p1 = pnand %p78_p0, %p75_p13 }
  0x21   :  { %83 = shalt.err (!%p80_p1)
}
  0x22   :  { %32 = dma.vmem_to_hbm [thread:$0]  %s30_s19, 128, %s125_s1, [#allocation4]  }
  0x23   :  { %86 = dma.done.wait [#allocation4], 128  }
  0x24   :  { %87 = vsyncadd [#allocation4], 4294967168 }
  0x25   :  { %36 = vsyncpa [#allocation3], 1 }
  0x26   :  { %37 = vsyncpa [#allocation4], 1 }

// kernel: tpu_custom_call.1
= control target key start
LH: loop header
LB: loop body
LE: loop exit
PB: predicated region body
PF: predicated region fallthrough
CT: control target
= control target key end

     0   :  { %s5268_s0 = inlined_call_operand.hbm [shape: f32[2,8,32], index: 0, kind: input, shape index: {}]   ;;  %s5269_s1 = inlined_call_operand.hbm [shape: f32[1,32], index: 1, kind: input, shape index: {}]   ;;  %s5270_s2 = inlined_call_operand.hbm [shape: f32[1,32], index: 2, kind: input, shape index: {}]   ;;  %s5271_s3 = inlined_call_operand.hbm [shape: bf16[32,32], index: 3, kind: input, shape index: {}]   ;;  %s5272_s4 = inlined_call_operand.hbm [shape: f32[1,32], index: 4, kind: input, shape index: {}]   ;;  %s5273_s5 = inlined_call_operand.hbm [shape: bf16[32,32], index: 5, kind: input, shape index: {}]   ;;  %s5274_s6 = inlined_call_operand.hbm [shape: f32[1,32], index: 6, kind: input, shape index: {}]   ;;  %s5275_s7 = inlined_call_operand.hbm [shape: bf16[32,32], index: 7, kind: input, shape index: {}]   ;;  %s5276_s8 = inlined_call_operand.hbm [shape: f32[1,32], index: 8, kind: input, shape index: {}]   ;;  %s5277_s9 = inlined_call_operand.hbm [shape: bf16[32,32], index: 9, kind: input, shape index: {}]   ;;  %s5278_s10 = inlined_call_operand.hbm [shape: f32[1,32], index: 10, kind: input, shape index: {}]   ;;  %s5279_s11 = inlined_call_operand.hbm [shape: f32[1,32], index: 11, kind: input, shape index: {}]   ;;  %s5280_s12 = inlined_call_operand.hbm [shape: f32[1,32], index: 12, kind: input, shape index: {}]   ;;  %s5281_s13 = inlined_call_operand.hbm [shape: bf16[32,128], index: 13, kind: input, shape index: {}]   ;;  %s5282_s14 = inlined_call_operand.hbm [shape: f32[1,128], index: 14, kind: input, shape index: {}]   ;;  %s5283_s15 = inlined_call_operand.hbm [shape: bf16[128,32], index: 15, kind: input, shape index: {}]   ;;  %s5284_s16 = inlined_call_operand.hbm [shape: f32[1,32], index: 16, kind: input, shape index: {}]   ;;  %s5285_s17 = inlined_call_operand.hbm [shape: f32[2,8,32], index: 17, kind: output, shape index: {}]  }
   0x1   :  { %5304 = sst [smem:[#allocation50_spill]] %s5268_s0 }
   0x2   :  { %5305 = sst [smem:[#allocation51_spill]] %s5269_s1 }
   0x3   :  { %5306 = sst [smem:[#allocation52_spill]] %s5270_s2 }
   0x4   :  { %5307 = sst [smem:[#allocation53_spill]] %s5271_s3 }
   0x5   :  { %5308 = sst [smem:[#allocation54_spill]] %s5272_s4 }
   0x6   :  { %5309 = sst [smem:[#allocation55_spill]] %s5273_s5 }
   0x7   :  { %5310 = sst [smem:[#allocation56_spill]] %s5285_s17 }
   0x8   :  { %22 = vsyncpa [#allocation5], 0 }
   0x9   :  { %24 = vsyncpa [#allocation5 + $0x1], 0 }
   0xa   :  { %25 = vsyncpa [#allocation8], 0 }
   0xb   :  { %26 = vsyncpa [#allocation11], 0 }
   0xc   :  { %27 = vsyncpa [#allocation14], 0 }
   0xd   :  { %28 = vsyncpa [#allocation17], 0 }
   0xe   :  { %29 = vsyncpa [#allocation20], 0 }
   0xf   :  { %30 = vsyncpa [#allocation23], 0 }
  0x10   :  { %31 = vsyncpa [#allocation26], 0 }
  0x11   :  { %32 = vsyncpa [#allocation29], 0 }
  0x12   :  { %33 = vsyncpa [#allocation6], 0 }
  0x13   :  { %35 = vsyncpa [#allocation6 + $0x1], 0  ;;  %s4514_s24 = smov 0   ;;  %s4516_s25 = smov 0  }
  0x14   :  { %s4518_s26 = smov 0   ;;  %s4520_s27 = smov 0  }
  0x15   :  { %s4522_s28 = smov 0   ;;  %s4524_s29 = smov 0  }
  0x16 LB: > { %5311 = sst [smem:[#allocation42_spill]] %s4370_s24  ;;  %s5288_s0 = sadd.s32 4294967295, %s4390_s29   ;;  %s4390_s29 = sphi %s4524_s29, %s41_s29   ;;  %s4386_s28 = sphi %s4522_s28, %s5360_s28   ;;  %s4382_s27 = sphi %s4520_s27, %s5359_s27   ;;  %s4378_s26 = sphi %s4518_s26, %s5358_s26   ;;  %s4374_s25 = sphi %s4516_s25, %s5356_s25   ;;  %s4370_s24 = sphi %s4514_s24, %s5355_s24  }
  0x17   : > { %5312 = sst [smem:[#allocation43_spill]] %s4374_s25  ;;  %p3263_p0 = scmp.ge.s32.totalorder %s4390_s29, 1 }
  0x18   : > { %5313 = sst [smem:[#allocation44_spill]] %s4378_s26  ;;  %p4548_p1 = scmp.eq.s32.totalorder %s5288_s0, 0 }
  0x19   : > { %5314 = sst [smem:[#allocation45_spill]] %s4382_s27  ;;  %p448_p2 = scmp.lt.s32.totalorder %s4390_s29, 3 }
  0x1a   : > { %5315 = sst [smem:[#allocation46_spill]] %s4386_s28  ;;  %s4392_s19 = smov [#allocation7]  }
  0x1b   : > { %5316 = sst [smem:[#allocation47_spill]] %s4390_s29  ;;  %p4553_p3 = pnand %p3263_p0, %p448_p2 }
  0x1c   : > { %s5317_s30 = scalar_select %p4548_p1, 1, 0 }
  0x1d   : > { %s5319_s18 = scalar_select %p4553_p3, 1, 0 }
  0x1e   : > { %5318 = sst [smem:[#allocation48_spill]] %s5317_s30  ;;  %s461_s1 = sshll.u32 %s4392_s19, 4  ;;  %s462_s1 = int_to_ptr.vmem [resolvable:$true] %s461_s1 }
  0x1f   : > { %5320 = sst [smem:[#allocation49_spill]] %s5319_s18  ;;  %p3578_p5 = pneg %p4553_p3 }
  0x20   : > { %s4393_s20 = smov [#allocation10]   ;;  %s4394_s23 = smov [#allocation13]  }
  0x21   : > { %s482_s21 = sshll.u32 %s4393_s20, 4  ;;  %p4562_p6 = pnand %p3578_p5, %p4548_p1  ;;  %s4566_s21 = int_to_ptr.vmem [resolvable:$true] %s482_s21 }
  0x22   : > { %s4568_s0 = sshll.u32 %s4394_s23, 4  ;;  %s5322_s19 = sld [smem:[#allocation51_spill]]  ;;  %s507_s0 = int_to_ptr.vmem [resolvable:$true] %s4568_s0 }
  0x23   : > { %p4578_p8 = pneg %p4562_p6 }
  0x28   : > { %s3798_s24 = scalar_lea.hbm %s5322_s19, 16 }
  0x29   : > { %p3799_p7 = scmp.ne.s32.totalorder %s5322_s19, %s3798_s24  ;;  %p3805_p11 = scmp.lt.u32.totalorder %s3798_s24, %s5322_s19 }
  0x2b   : > { %p3801_p9 = pnand %p4578_p8, %p3799_p7 }
  0x2d   : > { %p3802_p10 = pneg %p3801_p9 }
  0x2f   : > { %p3807_p12 = pnand %p3805_p11, %p3802_p10 }
  0x31   : > { %3810 = shalt.err (!%p3807_p12)
}
  0x32   : > { %s3811_s17 = scalar_lea.vmem %s462_s1, 16  ;;  %s3818_s25 = scalar_lea.vmem %s462_s1, 32 }
  0x33   : > { %p3812_p13 = scmp.ne.s32.totalorder %s462_s1, %s3811_s17  ;;  %p3819_p5 = scmp.lt.s32.totalorder %s462_s1, %s462_s1 }
  0x34   : > { %p3820_p4 = scmp.lt.s32.totalorder %s3818_s25, %s3811_s17 }
  0x35   : > { %p3814_p0 = pnand %p3812_p13, %p4578_p8 }
  0x36   : > { %p3821_p3 = por %p3820_p4, %p3819_p5 }
  0x37   : > { %p3815_p2 = pneg %p3814_p0 }
  0x39   : > { %p3822_p1 = pnand %p3821_p3, %p3815_p2 }
  0x3b   : > { %3825 = shalt.err (!%p3822_p1)
}
  0x3c   : > { %3581 = dma.hbm_to_vmem [thread:$0]  (!%p4562_p6), %s5322_s19, 16, %s462_s1, [#allocation8]  }
  0x3d   : > { %s5324_s3 = sld [smem:[#allocation53_spill]] }
  0x43   : > { %s3826_s23 = scalar_lea.hbm %s5324_s3, 256 }
  0x44   : > { %p3827_p7 = scmp.ne.s32.totalorder %s5324_s3, %s3826_s23  ;;  %p3833_p1 = scmp.lt.u32.totalorder %s3826_s23, %s5324_s3 }
  0x46   : > { %p3829_p9 = pnand %p3827_p7, %p4578_p8 }
  0x48   : > { %p3830_p4 = pneg %p3829_p9 }
  0x4a   : > { %p3835_p3 = pnand %p3833_p1, %p3830_p4 }
  0x4c   : > { %3838 = shalt.err (!%p3835_p3)
}
  0x4d   : > { %s3839_s1 = scalar_lea.vmem %s4566_s21, 256  ;;  %p3847_p13 = scmp.lt.s32.totalorder %s4566_s21, %s4566_s21 }
  0x4e   : > { %p3840_p10 = scmp.ne.s32.totalorder %s4566_s21, %s3839_s1  ;;  %p3848_p0 = scmp.lt.s32.totalorder %s3839_s1, %s3839_s1 }
  0x50   : > { %p3842_p11 = pnand %p3840_p10, %p4578_p8  ;;  %p3849_p2 = por %p3848_p0, %p3847_p13 }
  0x52   : > { %p3843_p12 = pneg %p3842_p11 }
  0x54   : > { %p3850_p5 = pnand %p3849_p2, %p3843_p12 }
  0x56   : > { %3853 = shalt.err (!%p3850_p5)
}
  0x57   : > { %s4395_s26 = smov 64   ;;  %s4396_s28 = smov 4  }
  0x58   : > { %3587 = dma.hbm_to_vmem [thread:$0]  (!%p4562_p6), %s5324_s3, 256, %s4566_s21, [#allocation11], %s4395_s26, %s4395_s26, %s4396_s28  }
  0x59   : > { %s5325_s5 = sld [smem:[#allocation55_spill]] }
  0x5f   : > { %s3854_s23 = scalar_lea.hbm %s5325_s5, 256 }
  0x60   : > { %p3855_p7 = scmp.ne.s32.totalorder %s5325_s5, %s3854_s23  ;;  %p3861_p1 = scmp.lt.u32.totalorder %s3854_s23, %s5325_s5 }
  0x62   : > { %p3857_p9 = pnand %p3855_p7, %p4578_p8 }
  0x64   : > { %p3858_p4 = pneg %p3857_p9 }
  0x66   : > { %p3863_p3 = pnand %p3861_p1, %p3858_p4 }
  0x68   : > { %3866 = shalt.err (!%p3863_p3)
}
  0x69   : > { %s3867_s27 = scalar_lea.vmem %s507_s0, 256  ;;  %p3875_p13 = scmp.lt.s32.totalorder %s507_s0, %s507_s0 }
  0x6a   : > { %p3868_p10 = scmp.ne.s32.totalorder %s507_s0, %s3867_s27  ;;  %p3876_p0 = scmp.lt.s32.totalorder %s3867_s27, %s3867_s27 }
  0x6c   : > { %p3870_p11 = pnand %p3868_p10, %p4578_p8  ;;  %p3877_p2 = por %p3876_p0, %p3875_p13 }
  0x6e   : > { %p3871_p12 = pneg %p3870_p11 }
  0x70   : > { %p3878_p5 = pnand %p3877_p2, %p3871_p12 }
  0x72   : > { %3881 = shalt.err (!%p3878_p5)
}
  0x73   : > { %3593 = dma.hbm_to_vmem [thread:$0]  (!%p4562_p6), %s5325_s5, 256, %s507_s0, [#allocation14], %s4395_s26, %s4395_s26, %s4396_s28  }
  0x74   : > { %s4397_s18 = smov [#allocation16]   ;;  %s4398_s30 = smov [#allocation19]  }
  0x75   : > { %s530_s24 = sshll.u32 %s4397_s18, 4  ;;  %s554_s23 = sshll.u32 %s4398_s30, 4  ;;  %s531_s24 = int_to_ptr.vmem [resolvable:$true] %s530_s24  ;;  %s555_s23 = int_to_ptr.vmem [resolvable:$true] %s554_s23 }
  0x76   : > { %s3882_s1 = scalar_lea.hbm %s5275_s7, 256 }
  0x77   : > { %p3883_p7 = scmp.ne.s32.totalorder %s5275_s7, %s3882_s1  ;;  %p3889_p1 = scmp.lt.u32.totalorder %s3882_s1, %s5275_s7 }
  0x79   : > { %p3885_p9 = pnand %p3883_p7, %p4578_p8 }
  0x7b   : > { %p3886_p4 = pneg %p3885_p9 }
  0x7d   : > { %p3891_p3 = pnand %p3889_p1, %p3886_p4 }
  0x7f   : > { %3894 = shalt.err (!%p3891_p3)
}
  0x80   : > { %s3895_s0 = scalar_lea.vmem %s531_s24, 256  ;;  %p3903_p13 = scmp.lt.s32.totalorder %s531_s24, %s531_s24 }
  0x81   : > { %p3896_p10 = scmp.ne.s32.totalorder %s531_s24, %s3895_s0  ;;  %p3904_p0 = scmp.lt.s32.totalorder %s3895_s0, %s3895_s0 }
  0x83   : > { %p3898_p11 = pnand %p3896_p10, %p4578_p8  ;;  %p3905_p2 = por %p3904_p0, %p3903_p13 }
  0x85   : > { %p3899_p12 = pneg %p3898_p11 }
  0x87   : > { %p3906_p5 = pnand %p3905_p2, %p3899_p12 }
  0x89   : > { %3909 = shalt.err (!%p3906_p5)
}
  0x8a   : > { %3599 = dma.hbm_to_vmem [thread:$0]  (!%p4562_p6), %s5275_s7, 256, %s531_s24, [#allocation17], %s4395_s26, %s4395_s26, %s4396_s28  }
  0x8b   : > { %s3910_s30 = scalar_lea.hbm %s5277_s9, 256 }
  0x8c   : > { %p3911_p7 = scmp.ne.s32.totalorder %s5277_s9, %s3910_s30  ;;  %p3917_p1 = scmp.lt.u32.totalorder %s3910_s30, %s5277_s9 }
  0x8e   : > { %p3913_p9 = pnand %p3911_p7, %p4578_p8 }
  0x90   : > { %p3914_p4 = pneg %p3913_p9 }
  0x92   : > { %p3919_p3 = pnand %p3917_p1, %p3914_p4 }
  0x94   : > { %3922 = shalt.err (!%p3919_p3)
}
  0x95   : > { %s3923_s21 = scalar_lea.vmem %s555_s23, 256  ;;  %p3931_p13 = scmp.lt.s32.totalorder %s555_s23, %s555_s23 }
  0x96   : > { %p3924_p10 = scmp.ne.s32.totalorder %s555_s23, %s3923_s21  ;;  %p3932_p0 = scmp.lt.s32.totalorder %s3923_s21, %s3923_s21 }
  0x98   : > { %p3926_p11 = pnand %p3924_p10, %p4578_p8  ;;  %p3933_p2 = por %p3932_p0, %p3931_p13 }
  0x9a   : > { %p3927_p12 = pneg %p3926_p11 }
  0x9c   : > { %p3934_p5 = pnand %p3933_p2, %p3927_p12 }
  0x9e   : > { %3937 = shalt.err (!%p3934_p5)
}
  0x9f   : > { %3605 = dma.hbm_to_vmem [thread:$0]  (!%p4562_p6), %s5277_s9, 256, %s555_s23, [#allocation20], %s4395_s26, %s4395_s26, %s4396_s28  }
  0xa0   : > { %s4399_s3 = smov [#allocation22]   ;;  %s4400_s19 = smov [#allocation25]  }
  0xa1   : > { %s579_s29 = sshll.u32 %s4399_s3, 4  ;;  %s600_s18 = sshll.u32 %s4400_s19, 4  ;;  %s580_s29 = int_to_ptr.vmem [resolvable:$true] %s579_s29  ;;  %s601_s18 = int_to_ptr.vmem [resolvable:$true] %s600_s18 }
  0xa2   : > { %s3938_s25 = scalar_lea.hbm %s5279_s11, 16 }
  0xa3   : > { %p3939_p7 = scmp.ne.s32.totalorder %s5279_s11, %s3938_s25  ;;  %p3945_p1 = scmp.lt.u32.totalorder %s3938_s25, %s5279_s11 }
  0xa5   : > { %p3941_p9 = pnand %p3939_p7, %p4578_p8 }
  0xa7   : > { %p3942_p4 = pneg %p3941_p9 }
  0xa9   : > { %p3947_p3 = pnand %p3945_p1, %p3942_p4 }
  0xab   : > { %3950 = shalt.err (!%p3947_p3)
}
  0xac   : > { %s3951_s23 = scalar_lea.vmem %s580_s29, 16  ;;  %s3958_s0 = scalar_lea.vmem %s580_s29, 32 }
  0xad   : > { %p3952_p10 = scmp.ne.s32.totalorder %s580_s29, %s3951_s23  ;;  %p3959_p13 = scmp.lt.s32.totalorder %s580_s29, %s580_s29 }
  0xae   : > { %p3960_p0 = scmp.lt.s32.totalorder %s3958_s0, %s3951_s23 }
  0xaf   : > { %p3954_p11 = pnand %p3952_p10, %p4578_p8 }
  0xb0   : > { %p3961_p2 = por %p3960_p0, %p3959_p13 }
  0xb1   : > { %p3955_p12 = pneg %p3954_p11 }
  0xb3   : > { %p3962_p5 = pnand %p3961_p2, %p3955_p12 }
  0xb5   : > { %3965 = shalt.err (!%p3962_p5)
}
  0xb6   : > { %3611 = dma.hbm_to_vmem [thread:$0]  (!%p4562_p6), %s5279_s11, 16, %s580_s29, [#allocation23]  }
  0xb7   : > { %s3966_s25 = scalar_lea.hbm %s5281_s13, 256 }
  0xb8   : > { %p3967_p7 = scmp.ne.s32.totalorder %s5281_s13, %s3966_s25  ;;  %p3973_p1 = scmp.lt.u32.totalorder %s3966_s25, %s5281_s13 }
  0xba   : > { %p3969_p9 = pnand %p3967_p7, %p4578_p8 }
  0xbc   : > { %p3970_p4 = pneg %p3969_p9 }
  0xbe   : > { %p3975_p3 = pnand %p3973_p1, %p3970_p4 }
  0xc0   : > { %3978 = shalt.err (!%p3975_p3)
}
  0xc1   : > { %s3979_s23 = scalar_lea.vmem %s601_s18, 256  ;;  %p3987_p13 = scmp.lt.s32.totalorder %s601_s18, %s601_s18 }
  0xc2   : > { %p3980_p10 = scmp.ne.s32.totalorder %s601_s18, %s3979_s23  ;;  %p3988_p0 = scmp.lt.s32.totalorder %s3979_s23, %s3979_s23 }
  0xc4   : > { %p3982_p11 = pnand %p3980_p10, %p4578_p8  ;;  %p3989_p2 = por %p3988_p0, %p3987_p13 }
  0xc6   : > { %p3983_p12 = pneg %p3982_p11 }
  0xc8   : > { %p3990_p5 = pnand %p3989_p2, %p3983_p12 }
  0xca   : > { %3993 = shalt.err (!%p3990_p5)
}
  0xcb   : > { %3617 = dma.hbm_to_vmem [thread:$0]  (!%p4562_p6), %s5281_s13, 256, %s601_s18, [#allocation26], %s4395_s26, %s4395_s26, %s4396_s28  }
  0xcc   : > { %s4401_s3 = smov [#allocation28]   ;;  %s4402_s30 = smov [#allocation9]  }
  0xcd   : > { %s624_s19 = sshll.u32 %s4401_s3, 4  ;;  %s472_s17 = sshll.u32 %s4402_s30, 4  ;;  %s625_s19 = int_to_ptr.vmem [resolvable:$true] %s624_s19  ;;  %s473_s17 = int_to_ptr.vmem [resolvable:$true] %s472_s17 }
  0xce   : > { %s3994_s27 = scalar_lea.hbm %s5283_s15, 1024 }
  0xcf   : > { %p3995_p7 = scmp.ne.s32.totalorder %s5283_s15, %s3994_s27  ;;  %p4001_p1 = scmp.lt.u32.totalorder %s3994_s27, %s5283_s15 }
  0xd1   : > { %p3997_p9 = pnand %p3995_p7, %p4578_p8 }
  0xd3   : > { %p3998_p4 = pneg %p3997_p9 }
  0xd5   : > { %p4003_p3 = pnand %p4001_p1, %p3998_p4 }
  0xd7   : > { %4006 = shalt.err (!%p4003_p3)
}
  0xd8   : > { %s4007_s18 = scalar_lea.vmem %s625_s19, 1024  ;;  %p4015_p13 = scmp.lt.s32.totalorder %s625_s19, %s625_s19 }
  0xd9   : > { %p4008_p10 = scmp.ne.s32.totalorder %s625_s19, %s4007_s18  ;;  %p4016_p0 = scmp.lt.s32.totalorder %s4007_s18, %s4007_s18 }
  0xdb   : > { %p4010_p11 = pnand %p4008_p10, %p4578_p8  ;;  %p4017_p2 = por %p4016_p0, %p4015_p13 }
  0xdd   : > { %p4011_p12 = pneg %p4010_p11 }
  0xdf   : > { %p4018_p5 = pnand %p4017_p2, %p4011_p12 }
  0xe1   : > { %4021 = shalt.err (!%p4018_p5)
}
  0xe2   : > { %3623 = dma.hbm_to_vmem [thread:$0]  (!%p4562_p6), %s5283_s15, 1024, %s625_s19, [#allocation29], %s4395_s26, %s4395_s26, %s4396_s28  }
  0xe3   : > { %s5326_s2 = sld [smem:[#allocation52_spill]] }
  0xe9   : > { %s4022_s1 = scalar_lea.hbm %s5326_s2, 16 }
  0xea   : > { %p4023_p7 = scmp.ne.s32.totalorder %s5326_s2, %s4022_s1  ;;  %p4029_p1 = scmp.lt.u32.totalorder %s4022_s1, %s5326_s2 }
  0xec   : > { %p4025_p9 = pnand %p4023_p7, %p4578_p8 }
  0xee   : > { %p4026_p4 = pneg %p4025_p9 }
  0xf0   : > { %p4031_p3 = pnand %p4029_p1, %p4026_p4 }
  0xf2   : > { %4034 = shalt.err (!%p4031_p3)
}
  0xf3   : > { %s4035_s29 = scalar_lea.vmem %s473_s17, 16  ;;  %s4042_s26 = scalar_lea.vmem %s473_s17, 32 }
  0xf4   : > { %p4036_p10 = scmp.ne.s32.totalorder %s473_s17, %s4035_s29  ;;  %p4043_p13 = scmp.lt.s32.totalorder %s473_s17, %s473_s17 }
  0xf5   : > { %p4044_p0 = scmp.lt.s32.totalorder %s4042_s26, %s4035_s29 }
  0xf6   : > { %p4038_p11 = pnand %p4036_p10, %p4578_p8 }
  0xf7   : > { %p4045_p2 = por %p4044_p0, %p4043_p13 }
  0xf8   : > { %p4039_p12 = pneg %p4038_p11 }
  0xfa   : > { %p4046_p5 = pnand %p4045_p2, %p4039_p12 }
  0xfc   : > { %4049 = shalt.err (!%p4046_p5)
}
  0xfd   : > { %3584 = dma.hbm_to_vmem [thread:$0]  (!%p4562_p6), %s5326_s2, 16, %s473_s17, [#allocation8]  }
  0xfe   : > { %s4403_s18 = smov [#allocation12]   ;;  %s4404_s3 = smov [#allocation15]  }
  0xff   : > { %s496_s0 = sshll.u32 %s4403_s18, 4  ;;  %s520_s30 = sshll.u32 %s4404_s3, 4  ;;  %s497_s0 = int_to_ptr.vmem [resolvable:$true] %s496_s0  ;;  %s521_s30 = int_to_ptr.vmem [resolvable:$true] %s520_s30 }
 0x100   : > { %s5327_s4 = sld [smem:[#allocation54_spill]] }
 0x106   : > { %s4050_s27 = scalar_lea.hbm %s5327_s4, 16 }
 0x107   : > { %p4051_p7 = scmp.ne.s32.totalorder %s5327_s4, %s4050_s27  ;;  %p4057_p1 = scmp.lt.u32.totalorder %s4050_s27, %s5327_s4 }
 0x109   : > { %p4053_p9 = pnand %p4051_p7, %p4578_p8 }
 0x10b   : > { %p4054_p4 = pneg %p4053_p9 }
 0x10d   : > { %p4059_p3 = pnand %p4057_p1, %p4054_p4 }
 0x10f   : > { %4062 = shalt.err (!%p4059_p3)
}
 0x110   : > { %s4063_s17 = scalar_lea.vmem %s497_s0, 16  ;;  %s4070_s26 = scalar_lea.vmem %s497_s0, 32 }
 0x111   : > { %p4064_p10 = scmp.ne.s32.totalorder %s497_s0, %s4063_s17  ;;  %p4071_p13 = scmp.lt.s32.totalorder %s497_s0, %s497_s0 }
 0x112   : > { %p4072_p0 = scmp.lt.s32.totalorder %s4070_s26, %s4063_s17 }
 0x113   : > { %p4066_p11 = pnand %p4064_p10, %p4578_p8 }
 0x114   : > { %p4073_p2 = por %p4072_p0, %p4071_p13 }
 0x115   : > { %p4067_p12 = pneg %p4066_p11 }
 0x117   : > { %p4074_p5 = pnand %p4073_p2, %p4067_p12 }
 0x119   : > { %4077 = shalt.err (!%p4074_p5)
}
 0x11a   : > { %3590 = dma.hbm_to_vmem [thread:$0]  (!%p4562_p6), %s5327_s4, 16, %s497_s0, [#allocation11]  }
 0x11b   : > { %s4078_s25 = scalar_lea.hbm %s5274_s6, 16 }
 0x11c   : > { %p4079_p7 = scmp.ne.s32.totalorder %s5274_s6, %s4078_s25  ;;  %p4085_p1 = scmp.lt.u32.totalorder %s4078_s25, %s5274_s6 }
 0x11e   : > { %p4081_p9 = pnand %p4079_p7, %p4578_p8 }
 0x120   : > { %p4082_p4 = pneg %p4081_p9 }
 0x122   : > { %p4087_p3 = pnand %p4085_p1, %p4082_p4 }
 0x124   : > { %4090 = shalt.err (!%p4087_p3)
}
 0x125   : > { %s4091_s23 = scalar_lea.vmem %s521_s30, 16  ;;  %s4098_s0 = scalar_lea.vmem %s521_s30, 32 }
 0x126   : > { %p4092_p10 = scmp.ne.s32.totalorder %s521_s30, %s4091_s23  ;;  %p4099_p13 = scmp.lt.s32.totalorder %s521_s30, %s521_s30 }
 0x127   : > { %p4100_p0 = scmp.lt.s32.totalorder %s4098_s0, %s4091_s23 }
 0x128   : > { %p4094_p11 = pnand %p4092_p10, %p4578_p8 }
 0x129   : > { %p4101_p2 = por %p4100_p0, %p4099_p13 }
 0x12a   : > { %p4095_p12 = pneg %p4094_p11 }
 0x12c   : > { %p4102_p5 = pnand %p4101_p2, %p4095_p12 }
 0x12e   : > { %4105 = shalt.err (!%p4102_p5)
}
 0x12f   : > { %3596 = dma.hbm_to_vmem [thread:$0]  (!%p4562_p6), %s5274_s6, 16, %s521_s30, [#allocation14]  }
 0x130   : > { %s4405_s26 = smov [#allocation18]   ;;  %s4406_s19 = smov [#allocation21]  }
 0x131   : > { %s544_s28 = sshll.u32 %s4405_s26, 4  ;;  %s568_s18 = sshll.u32 %s4406_s19, 4  ;;  %s545_s28 = int_to_ptr.vmem [resolvable:$true] %s544_s28  ;;  %s569_s18 = int_to_ptr.vmem [resolvable:$true] %s568_s18 }
 0x132   : > { %s4106_s1 = scalar_lea.hbm %s5276_s8, 16 }
 0x133   : > { %p4107_p7 = scmp.ne.s32.totalorder %s5276_s8, %s4106_s1  ;;  %p4113_p1 = scmp.lt.u32.totalorder %s4106_s1, %s5276_s8 }
 0x135   : > { %p4109_p9 = pnand %p4107_p7, %p4578_p8 }
 0x137   : > { %p4110_p4 = pneg %p4109_p9 }
 0x139   : > { %p4115_p3 = pnand %p4113_p1, %p4110_p4 }
 0x13b   : > { %4118 = shalt.err (!%p4115_p3)
}
 0x13c   : > { %s4119_s30 = scalar_lea.vmem %s545_s28, 16  ;;  %s4126_s0 = scalar_lea.vmem %s545_s28, 32 }
 0x13d   : > { %p4120_p10 = scmp.ne.s32.totalorder %s545_s28, %s4119_s30  ;;  %p4127_p13 = scmp.lt.s32.totalorder %s545_s28, %s545_s28 }
 0x13e   : > { %p4128_p0 = scmp.lt.s32.totalorder %s4126_s0, %s4119_s30 }
 0x13f   : > { %p4122_p11 = pnand %p4120_p10, %p4578_p8 }
 0x140   : > { %p4129_p2 = por %p4128_p0, %p4127_p13 }
 0x141   : > { %p4123_p12 = pneg %p4122_p11 }
 0x143   : > { %p4130_p5 = pnand %p4129_p2, %p4123_p12 }
 0x145   : > { %4133 = shalt.err (!%p4130_p5)
}
 0x146   : > { %3602 = dma.hbm_to_vmem [thread:$0]  (!%p4562_p6), %s5276_s8, 16, %s545_s28, [#allocation17]  }
 0x147   : > { %s4134_s3 = scalar_lea.hbm %s5278_s10, 16 }
 0x148   : > { %p4135_p7 = scmp.ne.s32.totalorder %s5278_s10, %s4134_s3  ;;  %p4141_p1 = scmp.lt.u32.totalorder %s4134_s3, %s5278_s10 }
 0x14a   : > { %p4137_p9 = pnand %p4135_p7, %p4578_p8 }
 0x14c   : > { %p4138_p4 = pneg %p4137_p9 }
 0x14e   : > { %p4143_p3 = pnand %p4141_p1, %p4138_p4 }
 0x150   : > { %4146 = shalt.err (!%p4143_p3)
}
 0x151   : > { %s4147_s24 = scalar_lea.vmem %s569_s18, 16  ;;  %s4154_s28 = scalar_lea.vmem %s569_s18, 32 }
 0x152   : > { %p4148_p10 = scmp.ne.s32.totalorder %s569_s18, %s4147_s24  ;;  %p4155_p13 = scmp.lt.s32.totalorder %s569_s18, %s569_s18 }
 0x153   : > { %p4156_p0 = scmp.lt.s32.totalorder %s4154_s28, %s4147_s24 }
 0x154   : > { %p4150_p11 = pnand %p4148_p10, %p4578_p8 }
 0x155   : > { %p4157_p2 = por %p4156_p0, %p4155_p13 }
 0x156   : > { %p4151_p12 = pneg %p4150_p11 }
 0x158   : > { %p4158_p5 = pnand %p4157_p2, %p4151_p12 }
 0x15a   : > { %4161 = shalt.err (!%p4158_p5)
}
 0x15b   : > { %3608 = dma.hbm_to_vmem [thread:$0]  (!%p4562_p6), %s5278_s10, 16, %s569_s18, [#allocation20]  }
 0x15c   : > { %s4407_s0 = smov [#allocation24]   ;;  %s4408_s17 = smov [#allocation27]  }
 0x15d   : > { %s590_s29 = sshll.u32 %s4407_s0, 4  ;;  %s614_s26 = sshll.u32 %s4408_s17, 4  ;;  %s591_s29 = int_to_ptr.vmem [resolvable:$true] %s590_s29  ;;  %s615_s26 = int_to_ptr.vmem [resolvable:$true] %s614_s26 }
 0x15e   : > { %s4162_s25 = scalar_lea.hbm %s5280_s12, 16 }
 0x15f   : > { %p4163_p7 = scmp.ne.s32.totalorder %s5280_s12, %s4162_s25  ;;  %p4169_p1 = scmp.lt.u32.totalorder %s4162_s25, %s5280_s12 }
 0x161   : > { %p4165_p9 = pnand %p4163_p7, %p4578_p8 }
 0x163   : > { %p4166_p4 = pneg %p4165_p9 }
 0x165   : > { %p4171_p3 = pnand %p4169_p1, %p4166_p4 }
 0x167   : > { %4174 = shalt.err (!%p4171_p3)
}
 0x168   : > { %s4175_s18 = scalar_lea.vmem %s591_s29, 16  ;;  %s4182_s28 = scalar_lea.vmem %s591_s29, 32 }
 0x169   : > { %p4176_p10 = scmp.ne.s32.totalorder %s591_s29, %s4175_s18  ;;  %p4183_p13 = scmp.lt.s32.totalorder %s591_s29, %s591_s29 }
 0x16a   : > { %p4184_p0 = scmp.lt.s32.totalorder %s4182_s28, %s4175_s18 }
 0x16b   : > { %p4178_p11 = pnand %p4176_p10, %p4578_p8 }
 0x16c   : > { %p4185_p2 = por %p4184_p0, %p4183_p13 }
 0x16d   : > { %p4179_p12 = pneg %p4178_p11 }
 0x16f   : > { %p4186_p5 = pnand %p4185_p2, %p4179_p12 }
 0x171   : > { %4189 = shalt.err (!%p4186_p5)
}
 0x172   : > { %3614 = dma.hbm_to_vmem [thread:$0]  (!%p4562_p6), %s5280_s12, 16, %s591_s29, [#allocation23]  }
 0x173   : > { %s4190_s19 = scalar_lea.hbm %s5282_s14, 16 }
 0x174   : > { %p4191_p7 = scmp.ne.s32.totalorder %s5282_s14, %s4190_s19  ;;  %p4197_p1 = scmp.lt.u32.totalorder %s4190_s19, %s5282_s14 }
 0x176   : > { %p4193_p9 = pnand %p4191_p7, %p4578_p8 }
 0x178   : > { %p4194_p4 = pneg %p4193_p9 }
 0x17a   : > { %p4199_p3 = pnand %p4197_p1, %p4194_p4 }
 0x17c   : > { %4202 = shalt.err (!%p4199_p3)
}
 0x17d   : > { %s4203_s21 = scalar_lea.vmem %s615_s26, 16  ;;  %s4210_s29 = scalar_lea.vmem %s615_s26, 32 }
 0x17e   : > { %p4204_p10 = scmp.ne.s32.totalorder %s615_s26, %s4203_s21  ;;  %p4211_p13 = scmp.lt.s32.totalorder %s615_s26, %s615_s26 }
 0x17f   : > { %p4212_p0 = scmp.lt.s32.totalorder %s4210_s29, %s4203_s21 }
 0x180   : > { %p4206_p11 = pnand %p4204_p10, %p4578_p8 }
 0x181   : > { %p4213_p2 = por %p4212_p0, %p4211_p13 }
 0x182   : > { %p4207_p12 = pneg %p4206_p11 }
 0x184   : > { %p4214_p5 = pnand %p4213_p2, %p4207_p12 }
 0x186   : > { %4217 = shalt.err (!%p4214_p5)
}
 0x187   : > { %3620 = dma.hbm_to_vmem [thread:$0]  (!%p4562_p6), %s5282_s14, 16, %s615_s26, [#allocation26]  }
 0x188   : > { %s4409_s28 = smov [#allocation30]   ;;  %s4218_s17 = scalar_lea.hbm %s5284_s16, 16 }
 0x189   : > { %s638_s23 = sshll.u32 %s4409_s28, 4  ;;  %p4219_p7 = scmp.ne.s32.totalorder %s5284_s16, %s4218_s17  ;;  %s639_s23 = int_to_ptr.vmem [resolvable:$true] %s638_s23 }
 0x18a   : > { %p4225_p1 = scmp.lt.u32.totalorder %s4218_s17, %s5284_s16 }
 0x18b   : > { %p4221_p9 = pnand %p4219_p7, %p4578_p8 }
 0x18d   : > { %p4222_p4 = pneg %p4221_p9 }
 0x18f   : > { %p4227_p3 = pnand %p4225_p1, %p4222_p4 }
 0x191   : > { %4230 = shalt.err (!%p4227_p3)
}
 0x192   : > { %s4231_s26 = scalar_lea.vmem %s639_s23, 16  ;;  %s4238_s27 = scalar_lea.vmem %s639_s23, 32 }
 0x193   : > { %p4232_p10 = scmp.ne.s32.totalorder %s639_s23, %s4231_s26  ;;  %p4239_p13 = scmp.lt.s32.totalorder %s639_s23, %s639_s23 }
 0x194   : > { %p4240_p0 = scmp.lt.s32.totalorder %s4238_s27, %s4231_s26 }
 0x195   : > { %p4234_p11 = pnand %p4232_p10, %p4578_p8 }
 0x196   : > { %p4241_p2 = por %p4240_p0, %p4239_p13 }
 0x197   : > { %p4235_p12 = pneg %p4234_p11 }
 0x199   : > { %p4242_p5 = pnand %p4241_p2, %p4235_p12 }
 0x19b   : > { %4245 = shalt.err (!%p4242_p5)
}
 0x19c   : > { %s5328_s24 = sld [smem:[#allocation47_spill]]  ;;  %s5329_s18 = sld [smem:[#allocation46_spill]] }
 0x19d   : > { %s5330_s28 = sld [smem:[#allocation44_spill]]  ;;  %s5331_s30 = sld [smem:[#allocation43_spill]] }
 0x19e   : > { %s5332_s20 = sld [smem:[#allocation42_spill]]  ;;  %s5333_s0 = sld [smem:[#allocation48_spill]] }
 0x19f   : > { %3626 = dma.hbm_to_vmem [thread:$0]  (!%p4562_p6), %s5284_s16, 16, %s639_s23, [#allocation29]  }
 0x1a2   : > { %s3262_s17 = sadd.s32 4294967294, %s5328_s24   ;;  %s53_s19 = sadd.s32 1, %s5329_s18 }
 0x1a3   : > { %p55_p8 = scmp.ge.s32.totalorder %s53_s19, 2  ;;  %s60_s22 = sadd.s32 1, %s5330_s28 }
 0x1a4   : > { %p67_p7 = scmp.ne.s32.totalorder %s5330_s28, %s5331_s30  ;;  %p68_p9 = scmp.eq.s32.totalorder %s5328_s24, 0 }
 0x1a5   : > { %s5362_s19 = smov (%p55_p8, %s53_s19), 0  ;;  %p73_p1 = scmp.ne.s32.totalorder %s5331_s30, %s5332_s20 }
 0x1a6   : > { %p4896_p4 = por %p68_p9, %p67_p7  ;;  %s57_s23 = ssub.s32 %s5329_s18, %s5362_s19 }
 0x1a7   : > { %s5335_s25 = sadd.s32 4294967295, %s5328_s24   ;;  %p58_p3 = scmp.eq.s32.totalorder %s57_s23, 0 }
 0x1a8   : > { %p435_p6 = scmp.eq.s32.totalorder %s5335_s25, 1  ;;  %p5336_p10 = scmp.ne.s32.totalorder %s5333_s0, 0 }
 0x1a9   : > { %p441_p13 = scmp.eq.s32.totalorder %s3262_s17, 1  ;;  %p3651_p2 = scmp.lt.s32.totalorder %s5328_s24, 2 }
 0x1aa   : > { %p4908_p11 = por %p5336_p10, %p73_p1  ;;  %p4912_p12 = por %p435_p6, %p67_p7 }
 0x1ab   : > { %s4917_s27 = scalar_select %p58_p3, %s5330_s28, %s60_s22  }
 0x1ac   : > { %s5338_s26 = scalar_select %p4912_p12, 1, 0 }
 0x1ad   : > { %p4919_p0 = por %p441_p13, %p73_p1  ;;  %s649_s29 = sand.u32 1, %s5330_s28  }
 0x1ae   : > { %s3282_s30 = sshll.u32 %s5329_s18, 7  ;;  %s3281_s20 = sshll.u32 %s649_s29, 3 }
 0x1af   : > { %s5339_s21 = scalar_select %p4919_p0, 1, 0 }
 0x1b0   : > { %s5340_s25 = sld [smem:[#allocation50_spill]]  ;;  %s653_s17 = scalar_lea.vmem [#allocation4], %s3281_s20 }
 0x1b1   : > { %s660_s22 = sshll.u32 %s653_s17, 4  ;;  %p4933_p5 = pnand %p3651_p2, %p4896_p4  ;;  %s4937_s22 = int_to_ptr.vmem [resolvable:$true] %s660_s22 }
 0x1b2   : > { %s650_s24 = scalar_lea.sflag [#allocation5], %s649_s29 }
 0x1b3   : > { %p4248_p7 = pneg %p4933_p5 }
 0x1b6   : > { %s5341_s2 = smov %s5340_s25  ;;  %s4929_s4 = scalar_lea.hbm %s5340_s25, %s3282_s30 }
 0x1b7   : > { %s4246_s18 = scalar_lea.hbm %s4929_s4, 128  ;;  %s4251_s3 = scalar_lea.hbm %s5341_s2, 256 }
 0x1b8   : > { %p4247_p8 = scmp.ne.s32.totalorder %s4929_s4, %s4246_s18  ;;  %p4252_p4 = scmp.lt.u32.totalorder %s4929_s4, %s5341_s2 }
 0x1b9   : > { %p4253_p6 = scmp.lt.u32.totalorder %s4251_s3, %s4246_s18  ;;  %p4255_p10 = scmp.lt.u32.totalorder %s4246_s18, %s4929_s4 }
 0x1ba   : > { %p4249_p9 = pnand %p4248_p7, %p4247_p8 }
 0x1bb   : > { %p4254_p3 = por %p4253_p6, %p4252_p4 }
 0x1bc   : > { %p4250_p1 = pneg %p4249_p9 }
 0x1bd   : > { %p4256_p13 = por %p4255_p10, %p4254_p3 }
 0x1bf   : > { %p4257_p2 = pnand %p4256_p13, %p4250_p1 }
 0x1c1   : > { %4260 = shalt.err (!%p4257_p2)
}
 0x1c2   : > { %s4261_s29 = scalar_lea.vmem %s4937_s22, 128  ;;  %s4410_s23 = smov [#allocation4]  }
 0x1c3   : > { %p4262_p8 = scmp.ne.s32.totalorder %s4937_s22, %s4261_s29  ;;  %s4266_s25 = sshll.u32 %s4410_s23, 4  ;;  %s4267_s25 = int_to_ptr.vmem [resolvable:$false] %s4266_s25 }
 0x1c4   : > { %s4268_s17 = scalar_lea.vmem %s4267_s25, 256  ;;  %p4269_p12 = scmp.lt.s32.totalorder %s4937_s22, %s4267_s25 }
 0x1c5   : > { %p4264_p9 = pnand %p4262_p8, %p4248_p7  ;;  %p4270_p4 = scmp.lt.s32.totalorder %s4268_s17, %s4261_s29 }
 0x1c7   : > { %p4265_p0 = pneg %p4264_p9  ;;  %p4271_p6 = por %p4270_p4, %p4269_p12 }
 0x1c9   : > { %p4272_p3 = pnand %p4271_p6, %p4265_p0 }
 0x1cb   : > { %4275 = shalt.err (!%p4272_p3)
}
 0x1cc   : > { %3630 = dma.hbm_to_vmem [thread:$0]  (!%p4933_p5), %s4929_s4, 128, %s4937_s22, %s650_s24  }
 0x1cd   : > { %s5343_s18 = sld [smem:[#allocation49_spill]] }
 0x1d3   : > { %p5344_p1 = scmp.ne.s32.totalorder %s5343_s18, 0 }
 0x1d4   : > { %s5345_s28 = sld [smem:[#allocation43_spill]] (!%p5344_p1) }
 0x1d5   : > { %669 = sbr.rel (%p5344_p1) target bundleno = 2932 (0xb74), region = 88 }
 0x1da   : > { %s4967_s30 = sand.u32 (!%p5344_p1), 1, %s5345_s28  }
 0x1db   : > { %s3284_s3 = sshll.u32 (!%p5344_p1), %s4967_s30, 3  ;;  %s672_s20 = scalar_lea.sflag (!%p5344_p1), [#allocation5], %s4967_s30 }
 0x1dc   : > { %s4973_s0 = scalar_lea.vmem [#allocation4], %s3284_s3 }
 0x1dd   : > { %4329 = dma.done.wait (%p4908_p11), %s672_s20, 128  }
 0x1de   : > { %4331 = vsyncadd (%p4908_p11), %s672_s20, 4294967168  ;;  %s5346_s4 = sld [smem:[#allocation48_spill]] }
 0x1e4   : > { %p5347_p12 = scmp.ne.s32.totalorder %s5346_s4, 0 }
 0x1e6   : > { %4333 = dma.done.wait (%p5347_p12), [#allocation8], 32  }
 0x1e7   : > { %4335 = vsyncadd (%p5347_p12), [#allocation8], 4294967264 }
 0x1e8   : > { %4337 = dma.done.wait (%p5347_p12), [#allocation11], 272  }
 0x1e9   : > { %4339 = vsyncadd (%p5347_p12), [#allocation11], 4294967024 }
 0x1ea   : > { %4341 = dma.done.wait (%p5347_p12), [#allocation14], 272  }
 0x1eb   : > { %4343 = vsyncadd (%p5347_p12), [#allocation14], 4294967024 }
 0x1ec   : > { %4345 = dma.done.wait (%p5347_p12), [#allocation17], 272  }
 0x1ed   : > { %4347 = vsyncadd (%p5347_p12), [#allocation17], 4294967024 }
 0x1ee   : > { %4349 = dma.done.wait (%p5347_p12), [#allocation20], 272  }
 0x1ef   : > { %4351 = vsyncadd (%p5347_p12), [#allocation20], 4294967024 }
 0x1f0   : > { %4353 = dma.done.wait (%p5347_p12), [#allocation23], 32  }
 0x1f1   : > { %4355 = vsyncadd (%p5347_p12), [#allocation23], 4294967264 }
 0x1f2   : > { %4357 = dma.done.wait (%p5347_p12), [#allocation26], 272  }
 0x1f3   : > { %4359 = vsyncadd (%p5347_p12), [#allocation26], 4294967024 }
 0x1f4   : > { %4361 = dma.done.wait (%p5347_p12), [#allocation29], 1040  }
 0x1f5   : > { %4363 = vsyncadd (%p5347_p12), [#allocation29], 4294966256  ;;  %vm798_vm0 = vcmask 261120   ;;  %v795_v0 = vld [vmem:[%s4973_s0] sm:$0xff]  ;;  %v4411_v13 = vmov 0.0   ;;  %vm4412_vm1 = vmmov 0   ;;  %v969_v61 = vlaneseq }
 0x1f6   : > { %v799_v1 = vsel %vm798_vm0, %v795_v0, 0.0  ;;  %v3747_v12 = vld [vmem:[#allocation13] sm:$0xff]   ;;  %3402 = vmatprep.subr.bf16.mxu0 %v4411_v13  ;;  %3426 = vmatprep.subr.bf16.mxu1 %v4411_v13  ;;  %v3748_v14 = vld [vmem:[#allocation13 + $0x8] sm:$0xff]   ;;  %v3749_v27 = vld [vmem:[#allocation16] sm:$0xff]   ;;  %s4413_s5 = smov 120   ;;  %s4414_s1 = smov 112  }
 0x1f7   : > { %800 = vadd.xlane.f32.xlu0 %v799_v1  ;;  %3403 = vmatpush3.bf16.msra.mxu0 %v3747_v12  ;;  %v3302_v22 = vld [vmem:[#allocation7] ss:$0 sm:$0xff]  ;;  %v3303_v24 = vld [vmem:[#allocation9] ss:$0 sm:$0xff]  ;;  %v3750_v30 = vld [vmem:[#allocation16 + $0x8] sm:$0xff]   ;;  %s4415_s22 = smov 104  }
 0x1f8   : > { %3404 = vmatprep.subr.bf16.mxu0 %v4411_v13  ;;  %3406 = vmatprep.mubr.msk.bf16.mxu0 %vm4412_vm1, %v4411_v13  ;;  %v3751_v32 = vld [vmem:[#allocation10] sm:$0xff]   ;;  %v3752_v34 = vld [vmem:[#allocation10 + $0x8] sm:$0xff]   ;;  %v3314_v48 = vld [vmem:[#allocation12] ss:$0 sm:$0xff]  ;;  %v4416_v59 = vmov 1983009808  }
 0x1f9   : > { %3428 = vmatprep.mubr.msk.bf16.mxu1 %vm4412_vm1, %v4411_v13  ;;  %v3304_v37 = vld [vmem:[#allocation15] ss:$0 sm:$0xff]  ;;  %v3308_v52 = vld [vmem:[#allocation18] ss:$0 sm:$0xff]  ;;  %v967_v60 = vunpack.c.l.s4 %v4416_v59  ;;  %v5042_v63 = vshrl.u32 %v969_v61, 7  ;;  %vm1131_vm2 = vcmask 60416  }
 0x1fa   : > { %vm2078_vm3 = vcmask 64512   ;;  %vm2334_vm4 = vcmask 1043456   ;;  %s4420_s24 = smov 16   ;;  %s4421_s29 = smov 8   ;;  %vm2677_vm6 = vcmask 130048   ;;  %vm2679_vm7 = vcmask 195584  }
 0x1fb   : > { %1319 = vadd.xlane.f32.xlu0 %v799_v1  ;;  %3405 = vmatpush3.bf16.msra.mxu0 %v3748_v14  ;;  %v968_v62 = vunpack.c.0.s8 %v967_v60  ;;  %s4422_s23 = smov 24   ;;  %s5348_s25 = sld [smem:[#allocation45_spill]] }
 0x1fc   : > { %3410 = vmatprep.subr.bf16.mxu0 %v4411_v13  ;;  %s789_s18 = scalar_lea.vmem [#allocation31], %s3284_s3  ;;  %s5349_s4 = sld [smem:[#allocation56_spill]] }
 0x1fd   : > { %s2979_s28 = sshll.u32 %s789_s18, 4  ;;  %s2965_s3 = scalar_lea.sflag [#allocation6], %s4967_s30  ;;  %s5220_s28 = int_to_ptr.vmem [resolvable:$true] %s2979_s28 }
 0x1fe   : > { %p5350_p0 = scmp.ne.s32.totalorder %s5338_s26, 0 }
 0x201   : > { %s3359_s17 = sshll.u32 %s5348_s25, 7 }
 0x284   : > { %v801_v2 = vpop.xlane.xlu0 %800 }
 0x285   : > { %v803_v3 = vmul.f32 0.03125, %v801_v2  ;;  %v5045_v2 = vsub.s32 %v968_v62, %v5042_v63 }
 0x287   : > { %v804_v4 = vsub.f32 %v795_v0, %v803_v3 }
 0x288   : > { %v1320_v5 = vpop.xlane.xlu0 %1319 }
 0x289   : > { %v1322_v6 = vmul.f32 0.03125, %v1320_v5  ;;  %v805_v7 = vmul.f32 %v804_v4, %v804_v4 }
 0x28b   : > { %v1323_v8 = vsub.f32 %v795_v0, %v1322_v6  ;;  %v806_v9 = vsel %vm798_vm0, %v805_v7, 0.0  ;;  %v4417_v0 = vmov 1934713408  }
 0x28c   : > { %807 = vadd.xlane.f32.xlu1 %v806_v9  ;;  %v984_v1 = vunpack.c.l.s4 %v4417_v0 }
 0x28d   : > { %v1324_v10 = vmul.f32 %v1323_v8, %v1323_v8 }
 0x28e   : > { %v985_v3 = vunpack.c.0.s8 %v984_v1 }
 0x28f   : > { %v1325_v11 = vsel %vm798_vm0, %v1324_v10, 0.0 }
 0x290   : > { %1326 = vadd.xlane.f32.xlu1 %v1325_v11  ;;  %v5049_v6 = vsub.s32 %v985_v3, %v5042_v63 }
 0x319   : > { %v808_v15 = vpop.xlane.xlu1 %807 }
 0x31a   : > { %v809_v16 = vmul.f32 0.03125, %v808_v15 }
 0x31c   : > { %v810_v17 = vadd.f32 1e-05, %v809_v16 }
 0x31d   : > { %v1327_v18 = vpop.xlane.xlu1 %1326 }
 0x31e   : > { %3765 = vrsqrt.f32 %v810_v17  ;;  %v1328_v19 = vmul.f32 0.03125, %v1327_v18 }
 0x320   : > { %v1329_v20 = vadd.f32 1e-05, %v1328_v19  ;;  %v4418_v19 = vmov 0  }
 0x322   : > { %3767 = vrsqrt.f32 %v1329_v20 }
 0x328   : > { %v3766_v21 = vpop.eup %3765 }
 0x329   : > { %v812_v23 = vmul.f32 %v3766_v21, %v804_v4 }
 0x32b   : > { %v819_v25 = vmul.f32 %v3302_v22, %v812_v23 }
 0x32c   : > { %v3768_v29 = vpop.eup %3767 }
 0x32d   : > { %v826_v26 = vadd.f32 %v3303_v24, %v819_v25  ;;  %v1331_v31 = vmul.f32 %v3768_v29, %v1323_v8 }
 0x32f   : > { %v827_v28 = vpack.c.bf16 %v826_v26, %v826_v26  ;;  %v1338_v33 = vmul.f32 %v3302_v22, %v1331_v31 }
 0x331   : > { %3407 = vmatmul.mubr.msk.bf16.vlgmr.msra.gmra.mrb[0].mxu0 %vm798_vm0, %v827_v28  ;;  %v1345_v35 = vadd.f32 %v3303_v24, %v1338_v33 }
 0x332   : > { %3411 = vmatpush3.bf16.msra.mxu0 %v3749_v27  ;;  %3414 = vmatprep.mubr.msk.bf16.mxu0 %vm4412_vm1, %v4411_v13 }
 0x333   : > { %3412 = vmatprep.subr.bf16.mxu0 %v4411_v13  ;;  %v1346_v36 = vpack.c.bf16 %v1345_v35, %v1345_v35 }
 0x336   : > { %3413 = vmatpush3.bf16.msra.mxu0 %v3750_v30 }
 0x337   : > { %3418 = vmatprep.subr.bf16.mxu0 %v4411_v13 }
 0x339   : > { %3415 = vmatmul.mubr.msk.bf16.vlgmr.msra.gmra.mrb[4].mxu0 %vm798_vm0, %v827_v28 }
 0x33a   : > { %3419 = vmatpush3.bf16.msra.mxu0 %v3751_v32  ;;  %3422 = vmatprep.mubr.msk.bf16.mxu0 %vm4412_vm1, %v4411_v13 }
 0x33b   : > { %3420 = vmatprep.subr.bf16.mxu0 %v4411_v13 }
 0x33e   : > { %3421 = vmatpush3.bf16.msra.mxu0 %v3752_v34 }
 0x33f   : > { %3432 = vmatprep.subr.bf16.mxu0 %v4411_v13 }
 0x341   : > { %3423 = vmatmul.mubr.msk.bf16.vlgmr.msra.gmra.mrb[8].mxu0 %vm798_vm0, %v1346_v36 }
 0x342   : > { %3434 = vmatprep.mubr.msk.bf16.mxu0 %vm4412_vm1, %v4411_v13 }
 0x404   : > { %v888_v38 = vpop.f32.mrb[0].mxu0 }
 0x405   : > { %v889_v39 = vadd.f32 %v3304_v37, %v888_v38  ;;  %v3408_v40 = vpop.f32.mrb[1].mxu0 }
 0x406   : > { %v891_v41 = vpop.f32.mrb[2].mxu0 }
 0x407   : > { %v894_v42 = vpack.c.bf16 %v889_v39, %v889_v39  ;;  %v3409_v43 = vpop.f32.mrb[3].mxu0 }
 0x409   : > { %960 = vrot.lane.b32.xlu0 %v894_v42, %s4413_s5  ;;  %962 = vrot.lane.b32.xlu1 %v894_v42, %s4414_s1  ;;  %v972_v5 = vrot.slane %v894_v42, %v5045_v2 }
 0x40c   : > { %v952_v44 = vpop.f32.mrb[4].mxu0 }
 0x40d   : > { %v3416_v45 = vpop.f32.mrb[5].mxu0  ;;  %964 = vrot.lane.b32.xlu1 %v894_v42, %s4415_s22  ;;  %v953_v56 = vadd.f32 %v3308_v52, %v952_v44 }
 0x40e   : > { %v955_v46 = vpop.f32.mrb[6].mxu0 }
 0x40f   : > { %v3417_v47 = vpop.f32.mrb[7].mxu0  ;;  %v5036_v58 = vpack.c.bf16 %v953_v56, %v953_v56 }
 0x411   : > { %v1149_v0 = vrot.slane %v5036_v58, %v5045_v2 }
 0x414   : > { %v1407_v49 = vpop.f32.mrb[8].mxu0 }
 0x415   : > { %v1408_v50 = vadd.f32 %v3314_v48, %v1407_v49  ;;  %v3424_v51 = vpop.f32.mrb[9].mxu0 }
 0x416   : > { %v1410_v53 = vpop.f32.mrb[10].mxu0 }
 0x417   : > { %v1413_v54 = vmul.f32 0.35355338, %v1408_v50  ;;  %v3425_v55 = vpop.f32.mrb[11].mxu0 }
 0x419   : > { %v1414_v57 = vpack.c.bf16 %v1413_v54, %v1413_v54 }
 0x41b   : > { %1418 = vrot.lane.b32.xlu0 %v1414_v57, %s4414_s1  ;;  %1416 = vrot.lane.b32.xlu1 %v1414_v57, %s4413_s5  ;;  %v1428_v50 = vrot.slane %v1414_v57, %v5045_v2 }
 0x41f   : > { %1137 = vrot.lane.b32.xlu0 %v5036_v58, %s4413_s5  ;;  %1420 = vrot.lane.b32.xlu1 %v1414_v57, %s4415_s22  ;;  %s5218_s5 = scalar_lea.hbm %s5349_s4, %s3359_s17 }
 0x423   : > { %1141 = vrot.lane.b32.xlu0 %v5036_v58, %s4415_s22  ;;  %1139 = vrot.lane.b32.xlu1 %v5036_v58, %s4414_s1  ;;  %s4276_s1 = scalar_lea.vmem %s5220_s28, 128  ;;  %s4423_s22 = smov [#allocation31]  }
 0x424   : > { %p4277_p11 = scmp.ne.s32.totalorder %s5220_s28, %s4276_s1 }
 0x426   : > { %p4278_p5 = pnand %p4277_p11, %p5350_p0 }
 0x428   : > { %p4279_p7 = pneg %p4278_p5 }
 0x47b   : > { %v963_v4 = vpop.permute.xlu1 %962  ;;  %v961_v10 = vpop.permute.xlu0 %960 }
 0x47c   : > { %v980_v7 = vrot.slane %v963_v4, %v5045_v2  ;;  %v1006_v15 = vrot.slane %v961_v10, %v5045_v2 }
 0x47e   : > { %v981_v8 = vcombine.low %v972_v5, %v980_v7  ;;  %v982_v9 = vcombine.high %v972_v5, %v980_v7 }
 0x47f   : > { %v965_v11 = vpop.permute.xlu1 %964 }
 0x480   : > { %v989_v12 = vrot.slane %v981_v8, %v5049_v6  ;;  %v1014_v14 = vrot.slane %v965_v11, %v5045_v2  ;;  %v996_v16 = vrot.slane %v982_v9, %v5049_v6 }
 0x482   : > { %v1015_v17 = vcombine.low %v1006_v15, %v1014_v14  ;;  %v1016_v18 = vcombine.high %v1006_v15, %v1014_v14  ;;  %v997_v20 = vcombine.high %v989_v12, %v4418_v19  ;;  %v998_v23 = vcombine.high %v996_v16, %v4418_v19 }
 0x483   : > { %v1037_v24 = vshrl.u32 %v989_v12, 16  ;;  %v1053_v30 = vshrl.u32 %v996_v16, 16 }
 0x484   : > { %v1023_v21 = vrot.slane %v1015_v17, %v5049_v6  ;;  %v1030_v22 = vrot.slane %v1016_v18, %v5049_v6  ;;  %v1045_v29 = vshrl.u32 %v997_v20, 16  ;;  %v1061_v37 = vshrl.u32 %v998_v23, 16 }
 0x486   : > { %v1031_v25 = vcombine.high %v1023_v21, %v4418_v19  ;;  %v1032_v26 = vcombine.high %v1030_v22, %v4418_v19  ;;  %v1035_v27 = vpack.i.b16 %v1023_v21, %v989_v12  ;;  %v1038_v28 = vshrl.u32 %v1023_v21, 16 }
 0x487   : > { %v1051_v31 = vpack.i.b16 %v1030_v22, %v996_v16  ;;  %v1054_v32 = vshrl.u32 %v1030_v22, 16 }
 0x488   : > { %v1039_v33 = vpack.i.b16 %v1038_v28, %v1037_v24  ;;  %v1043_v34 = vpack.i.b16 %v1031_v25, %v997_v20  ;;  %v1046_v35 = vshrl.u32 %v1031_v25, 16  ;;  %v1059_v36 = vpack.i.b16 %v1032_v26, %v998_v23 }
 0x489   : > { %v1055_v38 = vpack.i.b16 %v1054_v32, %v1053_v30  ;;  %v1062_v39 = vshrl.u32 %v1032_v26, 16  ;;  %v1065_v40 = vcombine.low %v1035_v27, %v1051_v31 }
 0x48a   : > { %v1047_v41 = vpack.i.b16 %v1046_v35, %v1045_v29  ;;  %v1073_v42 = vcombine.low %v1043_v34, %v1059_v36 }
 0x48b   : > { %v1063_v43 = vpack.i.b16 %v1062_v39, %v1061_v37  ;;  %v1090_v44 = vcombine.low %v1039_v33, %v1055_v38  ;;  %v1072_v45 = vrot.slane %v1065_v40, %v5045_v2 }
 0x48c   : > { %v1080_v46 = vrot.slane %v1073_v42, %v5045_v2 }
 0x48d   : > { %v1417_v47 = vpop.permute.xlu1 %1416  ;;  %v1419_v48 = vpop.permute.xlu0 %1418  ;;  %v1098_v49 = vcombine.low %v1047_v41, %v1063_v43  ;;  %v1097_v53 = vrot.slane %v1090_v44, %v5045_v2 }
 0x48e   : > { %v1436_v51 = vrot.slane %v1419_v48, %v5045_v2  ;;  %v1081_v52 = vcombine.low %v1072_v45, %v1080_v46  ;;  %v1462_v8 = vrot.slane %v1417_v47, %v5045_v2 }
 0x48f   : > { %v1105_v54 = vrot.slane %v1098_v49, %v5045_v2 }
 0x490   : > { %v1437_v55 = vcombine.low %v1428_v50, %v1436_v51  ;;  %v1438_v56 = vcombine.high %v1428_v50, %v1436_v51  ;;  %v1088_v59 = vrot.slane %v1081_v52, %v5049_v6 }
 0x491   : > { %v1421_v60 = vpop.permute.xlu1 %1420  ;;  %v1138_v62 = vpop.permute.xlu0 %1137  ;;  %v1106_v1 = vcombine.low %v1097_v53, %v1105_v54 }
 0x492   : > { %v1445_v57 = vrot.slane %v1437_v55, %v5049_v6  ;;  %v1452_v3 = vrot.slane %v1438_v56, %v5049_v6  ;;  %v1470_v4 = vrot.slane %v1421_v60, %v5045_v2  ;;  %v1089_v5 = vcombine.high %v1088_v59, %v4418_v19 }
 0x493   : > { %v1119_v7 = vshrl.u32 %v1088_v59, 16  ;;  %v5077_v9 = vrot.slane %v1138_v62, %v5045_v2  ;;  %v1113_v10 = vrot.slane %v1106_v1, %v5049_v6 }
 0x494   : > { %v1453_v11 = vcombine.high %v1445_v57, %v4418_v19  ;;  %v1454_v58 = vcombine.high %v1452_v3, %v4418_v19  ;;  %v1493_v12 = vshrl.u32 %v1445_v57, 16  ;;  %v1127_v14 = vshrl.u32 %v1089_v5, 16 }
 0x495   : > { %v1509_v15 = vshrl.u32 %v1452_v3, 16  ;;  %v1471_v16 = vcombine.low %v1462_v8, %v1470_v4  ;;  %v1472_v17 = vcombine.high %v1462_v8, %v1470_v4  ;;  %v1140_v18 = vpop.permute.xlu1 %1139  ;;  %v1142_v20 = vpop.permute.xlu0 %1141  ;;  %v1114_v21 = vcombine.high %v1113_v10, %v4418_v19 }
 0x496   : > { %v1117_v22 = vpack.i.b16 %v1113_v10, %v1088_v59  ;;  %v1120_v23 = vshrl.u32 %v1113_v10, 16  ;;  %v1501_v24 = vshrl.u32 %v1453_v11, 16  ;;  %v1517_v25 = vshrl.u32 %v1454_v58, 16 }
 0x497   : > { %v1479_v26 = vrot.slane %v1471_v16, %v5049_v6  ;;  %v1486_v27 = vrot.slane %v1472_v17, %v5049_v6  ;;  %v1157_v28 = vrot.slane %v1140_v18, %v5045_v2  ;;  %v1125_v30 = vpack.i.b16 %v1114_v21, %v1089_v5 }
 0x498   : > { %v1121_v29 = vpack.i.b16 %v1120_v23, %v1119_v7  ;;  %v1128_v31 = vshrl.u32 %v1114_v21, 16  ;;  %1132 = vst.msk [vmem:[#allocation2] sm:$0xf] %vm1131_vm2, %v1117_v22  ;;  %v1191_v32 = vrot.slane %v1142_v20, %v5045_v2 }
 0x499   : > { %v1487_v33 = vcombine.high %v1479_v26, %v4418_v19  ;;  %v1488_v34 = vcombine.high %v1486_v27, %v4418_v19  ;;  %v1491_v35 = vpack.i.b16 %v1479_v26, %v1445_v57  ;;  %v1494_v36 = vshrl.u32 %v1479_v26, 16  ;;  %1134 = vst.msk [vmem:[#allocation2 + $0x8] sm:$0xf] %vm1131_vm2, %v1125_v30 }
 0x49a   : > { %v1129_v37 = vpack.i.b16 %v1128_v31, %v1127_v14  ;;  %1133 = vst.msk [vmem:[#allocation2 + $0x4] sm:$0xf] %vm1131_vm2, %v1121_v29  ;;  %v1507_v38 = vpack.i.b16 %v1486_v27, %v1452_v3  ;;  %v1510_v39 = vshrl.u32 %v1486_v27, 16  ;;  %v1158_v40 = vcombine.low %v1149_v0, %v1157_v28 }
 0x49b   : > { %v1495_v41 = vpack.i.b16 %v1494_v36, %v1493_v12  ;;  %v1499_v42 = vpack.i.b16 %v1487_v33, %v1453_v11  ;;  %v1502_v43 = vshrl.u32 %v1487_v33, 16  ;;  %v1515_v44 = vpack.i.b16 %v1488_v34, %v1454_v58 }
 0x49c   : > { %1135 = vst.msk [vmem:[#allocation2 + $0xc] sm:$0xf] %vm1131_vm2, %v1129_v37  ;;  %v1511_v45 = vpack.i.b16 %v1510_v39, %v1509_v15  ;;  %v1518_v46 = vshrl.u32 %v1488_v34, 16  ;;  %v1521_v47 = vcombine.low %v1491_v35, %v1507_v38  ;;  %v1159_v48 = vcombine.high %v1149_v0, %v1157_v28 }
 0x49d   : > { %v1503_v49 = vpack.i.b16 %v1502_v43, %v1501_v24  ;;  %v1529_v50 = vcombine.low %v1499_v42, %v1515_v44  ;;  %v1166_v51 = vrot.slane %v1158_v40, %v5049_v6  ;;  %v1192_v52 = vcombine.low %v5077_v9, %v1191_v32 }
 0x49e   : > { %v1519_v53 = vpack.i.b16 %v1518_v46, %v1517_v25  ;;  %v1528_v54 = vrot.slane %v1521_v47, %v5045_v2  ;;  %v1546_v55 = vcombine.low %v1495_v41, %v1511_v45  ;;  %v1173_v56 = vrot.slane %v1159_v48, %v5049_v6 }
 0x49f   : > { %v1536_v59 = vrot.slane %v1529_v50, %v5045_v2  ;;  %v1174_v60 = vcombine.high %v1166_v51, %v4418_v19  ;;  %v1214_v62 = vshrl.u32 %v1166_v51, 16  ;;  %v1193_v1 = vcombine.high %v5077_v9, %v1191_v32  ;;  %v2068_v0 = vld [vmem:[#allocation2] sm:$0xf] }
 0x4a0   : > { %v1553_v57 = vrot.slane %v1546_v55, %v5045_v2  ;;  %v1554_v3 = vcombine.low %v1503_v49, %v1519_v53  ;;  %v1175_v4 = vcombine.high %v1173_v56, %v4418_v19  ;;  %v1230_v5 = vshrl.u32 %v1173_v56, 16  ;;  %v2070_v35 = vld [vmem:[#allocation2 + $0x8] sm:$0xf] }
 0x4a1   : > { %v1222_v7 = vshrl.u32 %v1174_v60, 16  ;;  %v1200_v8 = vrot.slane %v1192_v52, %v5049_v6  ;;  %v1207_v10 = vrot.slane %v1193_v1, %v5049_v6  ;;  %v2083_v11 = vsel %vm2078_vm3, %v2068_v0, 0  ;;  %v2069_v58 = vld [vmem:[#allocation2 + $0x4] sm:$0xf] }
 0x4a2   : > { %v1238_v12 = vshrl.u32 %v1175_v4, 16  ;;  %3427 = vmatpush3.bf16.xpose.msra.mxu1 %v2083_v11  ;;  %v2129_v14 = vsel %vm2078_vm3, %v2069_v58, 0  ;;  %v1537_v9 = vcombine.low %v1528_v54, %v1536_v59  ;;  %v1561_v15 = vrot.slane %v1554_v3, %v5045_v2 }
 0x4a3   : > { %v1208_v16 = vcombine.high %v1200_v8, %v4418_v19  ;;  %v1209_v17 = vcombine.high %v1207_v10, %v4418_v19  ;;  %v1212_v18 = vpack.i.b16 %v1200_v8, %v1166_v51  ;;  %v1215_v20 = vshrl.u32 %v1200_v8, 16  ;;  %3433 = vmatpush3.bf16.xpose.msra.mxu0 %v2129_v14  ;;  %3438 = vmatprep.subr.bf16.mxu1 %v4411_v13  ;;  %v2071_v45 = vld [vmem:[#allocation2 + $0xc] sm:$0xf] }
 0x4a4   : > { %v1228_v21 = vpack.i.b16 %v1207_v10, %v1173_v56  ;;  %v1231_v22 = vshrl.u32 %v1207_v10, 16  ;;  %v1544_v23 = vrot.slane %v1537_v9, %v5049_v6  ;;  %v1562_v24 = vcombine.low %v1553_v57, %v1561_v15  ;;  %3444 = vmatprep.subr.bf16.mxu0 %v4411_v13 }
 0x4a5   : > { %v1216_v25 = vpack.i.b16 %v1215_v20, %v1214_v62  ;;  %v1220_v26 = vpack.i.b16 %v1208_v16, %v1174_v60  ;;  %v1223_v27 = vshrl.u32 %v1208_v16, 16  ;;  %v1236_v28 = vpack.i.b16 %v1209_v17, %v1175_v4 }
 0x4a6   : > { %v1232_v29 = vpack.i.b16 %v1231_v22, %v1230_v5  ;;  %v1239_v30 = vshrl.u32 %v1209_v17, 16  ;;  %v1242_v31 = vcombine.low %v1212_v18, %v1228_v21  ;;  %v1569_v32 = vrot.slane %v1562_v24, %v5049_v6 }
 0x4a7   : > { %v1224_v33 = vpack.i.b16 %v1223_v27, %v1222_v7  ;;  %v1250_v34 = vcombine.low %v1220_v26, %v1236_v28  ;;  %v1574_v41 = vshrl.u32 %v1544_v23, 16  ;;  %v2175_v44 = vsel %vm2078_vm3, %v2070_v35, 0 }
 0x4a8   : > { %v1240_v36 = vpack.i.b16 %v1239_v30, %v1238_v12  ;;  %v1267_v37 = vcombine.low %v1216_v25, %v1232_v29  ;;  %v1573_v38 = vpack.i.b16 %v1569_v32, %v1544_v23  ;;  %v1249_v39 = vrot.slane %v1242_v31, %v5045_v2 }
 0x4a9   : > { %v1257_v40 = vrot.slane %v1250_v34, %v5045_v2  ;;  %v1575_v42 = vshrl.u32 %v1569_v32, 16  ;;  %v1570_v48 = vcombine.high %v1569_v32, %v4418_v19  ;;  %v2221_v52 = vsel %vm2078_vm3, %v2071_v45, 0 }
 0x4aa   : > { %v1275_v43 = vcombine.low %v1224_v33, %v1240_v36  ;;  %3429 = vmatmul.mubr.msk.bf16.vlgmr.msra.gmra.mrb[0].mxu1 %vm2078_vm3, %v1573_v38  ;;  %v1274_v49 = vrot.slane %v1267_v37, %v5045_v2  ;;  %v1545_v53 = vcombine.high %v1544_v23, %v4418_v19  ;;  %v2061_v9 = vand.u32 127, %v969_v61 }
 0x4ab   : > { %v1258_v46 = vcombine.low %v1249_v39, %v1257_v40  ;;  %3439 = vmatpush3.bf16.xpose.msra.mxu1 %v2175_v44  ;;  %v1576_v47 = vpack.i.b16 %v1575_v42, %v1574_v41  ;;  %3440 = vmatprep.mubr.msk.bf16.mxu1 %vm4412_vm1, %v4411_v13  ;;  %v1581_v55 = vshrl.u32 %v1570_v48, 16  ;;  %v4419_v15 = vmov -1e+30  }
 0x4ac   : > { %v1282_v50 = vrot.slane %v1275_v43, %v5045_v2  ;;  %3450 = vmatprep.subr.bf16.mxu1 %v4411_v13  ;;  %v1579_v60 = vpack.i.b16 %v1570_v48, %v1545_v53  ;;  %v1580_v62 = vshrl.u32 %v1545_v53, 16  ;;  %vm2062_vm5 = vcmp.le.s32.totalorder %v2061_v9, %v5042_v63 }
 0x4ad   : > { %v1265_v51 = vrot.slane %v1258_v46, %v5049_v6  ;;  %3435 = vmatmul.mubr.msk.bf16.vlgmr.msra.gmra.mrb[12].mxu0 %vm2078_vm3, %v1576_v47  ;;  %v2063_v16 = vsel %vm2062_vm5, 0.0, %v4419_v15 }
 0x4ae   : > { %v1283_v54 = vcombine.low %v1274_v49, %v1282_v50  ;;  %3445 = vmatpush3.bf16.xpose.msra.mxu0 %v2221_v52  ;;  %3446 = vmatprep.mubr.msk.bf16.mxu0 %vm4412_vm1, %v4411_v13  ;;  %v1582_v4 = vpack.i.b16 %v1581_v55, %v1580_v62 }
 0x4af   : > { %3456 = vmatprep.subr.bf16.mxu0 %v4411_v13  ;;  %v1266_v56 = vcombine.high %v1265_v51, %v4418_v19  ;;  %v1296_v57 = vshrl.u32 %v1265_v51, 16 }
 0x4b0   : > { %v1290_v59 = vrot.slane %v1283_v54, %v5049_v6 }
 0x4b1   : > { %v1304_v8 = vshrl.u32 %v1266_v56, 16 }
 0x4b2   : > { %v1291_v1 = vcombine.high %v1290_v59, %v4418_v19  ;;  %v1294_v0 = vpack.i.b16 %v1290_v59, %v1265_v51  ;;  %v1297_v3 = vshrl.u32 %v1290_v59, 16  ;;  %3441 = vmatmul.mubr.msk.bf16.vlgmr.msra.gmra.mrb[4].mxu1 %vm2078_vm3, %v1579_v60 }
 0x4b3   : > { %3452 = vmatprep.mubr.msk.bf16.mxu1 %vm4412_vm1, %v4411_v13 }
 0x4b4   : > { %v1298_v5 = vpack.i.b16 %v1297_v3, %v1296_v57  ;;  %v1302_v7 = vpack.i.b16 %v1291_v1, %v1266_v56  ;;  %v1305_v10 = vshrl.u32 %v1291_v1, 16  ;;  %1308 = vst.msk [vmem:[#allocation3] sm:$0xf] %vm1131_vm2, %v1294_v0 }
 0x4b5   : > { %3447 = vmatmul.mubr.msk.bf16.vlgmr.msra.gmra.mrb[16].mxu0 %vm2078_vm3, %v1582_v4 }
 0x4b6   : > { %v1306_v11 = vpack.i.b16 %v1305_v10, %v1304_v8  ;;  %1309 = vst.msk [vmem:[#allocation3 + $0x4] sm:$0xf] %vm1131_vm2, %v1298_v5  ;;  %1310 = vst.msk [vmem:[#allocation3 + $0x8] sm:$0xf] %vm1131_vm2, %v1302_v7  ;;  %3458 = vmatprep.mubr.msk.bf16.mxu0 %vm4412_vm1, %v4411_v13 }
 0x4b8   : > { %1311 = vst.msk [vmem:[#allocation3 + $0xc] sm:$0xf] %vm1131_vm2, %v1306_v11 }
 0x4bb   : > { %v2074_v19 = vld [vmem:[#allocation3] sm:$0xf] }
 0x4bc   : > { %v2336_v58 = vsel %vm2334_vm4, %v2074_v19, 0 }
 0x4bd   : > { %3451 = vmatpush3.bf16.msra.mxu1 %v2336_v58  ;;  %v2075_v12 = vld [vmem:[#allocation3 + $0x4] sm:$0xf]  ;;  %v2076_v59 = vld [vmem:[#allocation3 + $0x8] sm:$0xf] }
 0x4be   : > { %v2382_v14 = vsel %vm2334_vm4, %v2075_v12, 0  ;;  %3462 = vmatprep.subr.bf16.mxu1 %v4411_v13  ;;  %v2428_v0 = vsel %vm2334_vm4, %v2076_v59, 0  ;;  %v3753_v12 = vld [vmem:[#allocation19] sm:$0xff]  }
 0x4bf   : > { %3457 = vmatpush3.bf16.msra.mxu0 %v2382_v14  ;;  %v2077_v57 = vld [vmem:[#allocation3 + $0xc] sm:$0xf] }
 0x4c0   : > { %3468 = vmatprep.subr.bf16.mxu0 %v4411_v13  ;;  %v2474_v5 = vsel %vm2334_vm4, %v2077_v57, 0 }
 0x57d   : > { %v2119_v17 = vpop.f32.mrb[0].mxu1 }
 0x57e   : > { %v2120_v18 = vadd.f32 %v2119_v17, %v2063_v16  ;;  %v3430_v20 = vpop.f32.mrb[1].mxu1 }
 0x57f   : > { %v2122_v21 = vpop.f32.mrb[2].mxu1 }
 0x580   : > { %v2165_v22 = vpop.f32.mrb[12].mxu0  ;;  %v3431_v23 = vpop.f32.mrb[3].mxu1  ;;  %v2263_v24 = vsel %vm2078_vm3, %v2120_v18, -inf }
 0x581   : > { %v2166_v25 = vadd.f32 %v2165_v22, %v2063_v16  ;;  %v3436_v26 = vpop.f32.mrb[13].mxu0  ;;  %2264 = vmax.xlane.f32.xlu1 %v2263_v24 }
 0x582   : > { %v2168_v27 = vpop.f32.mrb[14].mxu0 }
 0x583   : > { %v3437_v28 = vpop.f32.mrb[15].mxu0  ;;  %v2266_v29 = vsel %vm2078_vm3, %v2166_v25, -inf }
 0x584   : > { %2267 = vmax.xlane.f32.xlu0 %v2266_v29 }
 0x585   : > { %v2211_v61 = vpop.f32.mrb[4].mxu1 }
 0x586   : > { %v2212_v63 = vadd.f32 %v2211_v61, %v2063_v16  ;;  %v3442_v30 = vpop.f32.mrb[5].mxu1 }
 0x587   : > { %v2214_v31 = vpop.f32.mrb[6].mxu1 }
 0x588   : > { %v2257_v32 = vpop.f32.mrb[16].mxu0  ;;  %v3443_v33 = vpop.f32.mrb[7].mxu1  ;;  %v2269_v34 = vsel %vm2078_vm3, %v2212_v63, -inf }
 0x589   : > { %v2258_v35 = vadd.f32 %v2257_v32, %v2063_v16  ;;  %v3448_v36 = vpop.f32.mrb[17].mxu0  ;;  %2270 = vmax.xlane.f32.xlu0 %v2269_v34 }
 0x58a   : > { %v2260_v37 = vpop.f32.mrb[18].mxu0 }
 0x58b   : > { %v3449_v38 = vpop.f32.mrb[19].mxu0  ;;  %v2272_v39 = vsel %vm2078_vm3, %v2258_v35, -inf }
 0x58d   : > { %2273 = vmax.xlane.f32.xlu0 %v2272_v39 }
 0x60e   : > { %v2265_v40 = vpop.xlane.xlu1 %2264 }
 0x60f   : > { %v2275_v41 = vmax.f32 %v2265_v40, -1e+30 }
 0x611   : > { %v2291_v42 = vsub.f32 %v2120_v18, %v2275_v41  ;;  %v2268_v43 = vpop.xlane.xlu0 %2267  ;;  %v2279_v14 = vsub.f32 -1e+30, %v2275_v41 }
 0x612   : > { %v2276_v44 = vmax.f32 %v2268_v43, -1e+30 }
 0x613   : > { %v2295_v45 = vmul.f32 1.442695, %v2291_v42  ;;  %v2283_v15 = vmul.f32 1.442695, %v2279_v14 }
 0x614   : > { %v2292_v46 = vsub.f32 %v2166_v25, %v2276_v44  ;;  %v2280_v9 = vsub.f32 -1e+30, %v2276_v44 }
 0x615   : > { %3769 = vpow2.f32 %v2295_v45 }
 0x616   : > { %v2297_v47 = vmul.f32 1.442695, %v2292_v46  ;;  %v2271_v48 = vpop.xlane.xlu0 %2270  ;;  %v2285_v16 = vmul.f32 1.442695, %v2280_v9 }
 0x617   : > { %v2277_v49 = vmax.f32 %v2271_v48, -1e+30 }
 0x618   : > { %3771 = vpow2.f32 %v2297_v47 }
 0x619   : > { %v2293_v50 = vsub.f32 %v2212_v63, %v2277_v49  ;;  %v2281_v17 = vsub.f32 -1e+30, %v2277_v49 }
 0x61a   : > { %v2274_v51 = vpop.xlane.xlu0 %2273 }
 0x61b   : > { %v2299_v52 = vmul.f32 1.442695, %v2293_v50  ;;  %v2278_v53 = vmax.f32 %v2274_v51, -1e+30  ;;  %v2287_v18 = vmul.f32 1.442695, %v2281_v17 }
 0x61d   : > { %v2294_v54 = vsub.f32 %v2258_v35, %v2278_v53  ;;  %3773 = vpow2.f32 %v2299_v52  ;;  %v2282_v20 = vsub.f32 -1e+30, %v2278_v53 }
 0x61f   : > { %v2301_v55 = vmul.f32 1.442695, %v2294_v54  ;;  %v3770_v56 = vpop.eup %3769  ;;  %v2289_v21 = vmul.f32 1.442695, %v2282_v20 }
 0x620   : > { %v2307_v60 = vsel %vm2078_vm3, %v3770_v56, 0.0  ;;  %v2327_v62 = vpack.c.bf16 %v3770_v56, %v3770_v56 }
 0x621   : > { %3775 = vpow2.f32 %v2301_v55  ;;  %2308 = vadd.xlane.f32.xlu1 %v2307_v60 }
 0x622   : > { %v3772_v1 = vpop.eup %3771  ;;  %3453 = vmatmul.mubr.msk.bf16.vlgmr.msra.gmra.mrb[8].mxu1 %vm2078_vm3, %v2327_v62  ;;  %3777 = vpow2.f32 %v2283_v15 }
 0x623   : > { %3463 = vmatpush3.bf16.msra.mxu1 %v2428_v0  ;;  %v2310_v3 = vsel %vm2078_vm3, %v3772_v1, 0.0  ;;  %v2328_v4 = vpack.c.bf16 %v3772_v1, %v3772_v1  ;;  %3464 = vmatprep.mubr.msk.bf16.mxu1 %vm4412_vm1, %v4411_v13  ;;  %3779 = vpow2.f32 %v2285_v16  ;;  %v3754_v16 = vld [vmem:[#allocation19 + $0x8] sm:$0xff]  }
 0x624   : > { %2311 = vadd.xlane.f32.xlu0 %v2310_v3  ;;  %3474 = vmatprep.subr.bf16.mxu1 %v4411_v13  ;;  %3781 = vpow2.f32 %v2287_v18 }
 0x625   : > { %3459 = vmatmul.mubr.msk.bf16.vlgmr.msra.gmra.mrb[20].mxu0 %vm2078_vm3, %v2328_v4  ;;  %3783 = vpow2.f32 %v2289_v21 }
 0x626   : > { %3469 = vmatpush3.bf16.msra.mxu0 %v2474_v5  ;;  %3470 = vmatprep.mubr.msk.bf16.mxu0 %vm4412_vm1, %v4411_v13 }
 0x627   : > { %v3774_v7 = vpop.eup %3773  ;;  %3482 = vmatprep.subr.bf16.mxu0 %v4411_v13 }
 0x628   : > { %v2313_v8 = vsel %vm2078_vm3, %v3774_v7, 0.0  ;;  %v2329_v10 = vpack.c.bf16 %v3774_v7, %v3774_v7 }
 0x629   : > { %2314 = vadd.xlane.f32.xlu1 %v2313_v8 }
 0x62a   : > { %3465 = vmatmul.mubr.msk.bf16.vlgmr.msra.gmra.mrb[12].mxu1 %vm2078_vm3, %v2329_v10 }
 0x62b   : > { %v3776_v11 = vpop.eup %3775  ;;  %3478 = vmatprep.mubr.msk.bf16.mxu1 %vm4412_vm1, %v4411_v13  ;;  %3475 = vmatpush3.bf16.msra.mxu1 %v3753_v12 }
 0x62c   : > { %v2316_v19 = vsel %vm2078_vm3, %v3776_v11, 0.0  ;;  %v2330_v58 = vpack.c.bf16 %v3776_v11, %v3776_v11  ;;  %3476 = vmatprep.subr.bf16.mxu1 %v4411_v13  ;;  %v3778_v22 = vpop.eup %3777 }
 0x62d   : > { %2317 = vadd.xlane.f32.xlu0 %v2316_v19  ;;  %v3780_v24 = vpop.eup %3779  ;;  %v2303_v25 = vmul.f32 0.0, %v3778_v22 }
 0x62e   : > { %3471 = vmatmul.mubr.msk.bf16.vlgmr.msra.gmra.mrb[24].mxu0 %vm2078_vm3, %v2330_v58  ;;  %v2304_v28 = vmul.f32 0.0, %v3780_v24  ;;  %v3782_v29 = vpop.eup %3781 }
 0x62f   : > { %3486 = vmatprep.mubr.msk.bf16.mxu0 %vm4412_vm1, %v4411_v13  ;;  %v2305_v30 = vmul.f32 0.0, %v3782_v29  ;;  %v3784_v31 = vpop.eup %3783  ;;  %3477 = vmatpush3.bf16.msra.mxu1 %v3754_v16  ;;  %v3762_v16 = vld [vmem:[#allocation28 + $0x28] sm:$0xff]  }
 0x630   : > { %v2306_v34 = vmul.f32 0.0, %v3784_v31  ;;  %3490 = vmatprep.subr.bf16.mxu1 %v4411_v13 }
 0x6ae   : > { %v2309_v23 = vpop.xlane.xlu1 %2308 }
 0x6af   : > { %v2319_v26 = vadd.f32 %v2309_v23, %v2303_v25 }
 0x6b1   : > { %v2312_v27 = vpop.xlane.xlu0 %2311  ;;  %3785 = vrcp.f32 %v2319_v26 }
 0x6b2   : > { %v2320_v61 = vadd.f32 %v2312_v27, %v2304_v28 }
 0x6b4   : > { %3787 = vrcp.f32 %v2320_v61 }
 0x6b6   : > { %v2315_v63 = vpop.xlane.xlu1 %2314 }
 0x6b7   : > { %v2321_v32 = vadd.f32 %v2315_v63, %v2305_v30 }
 0x6b9   : > { %3789 = vrcp.f32 %v2321_v32 }
 0x6ba   : > { %v2318_v33 = vpop.xlane.xlu0 %2317 }
 0x6bb   : > { %v2322_v35 = vadd.f32 %v2318_v33, %v2306_v34  ;;  %v3786_v39 = vpop.eup %3785 }
 0x6bd   : > { %3791 = vrcp.f32 %v2322_v35 }
 0x6be   : > { %v3788_v46 = vpop.eup %3787 }
 0x6c3   : > { %v3790_v53 = vpop.eup %3789 }
 0x6c7   : > { %v3792_v57 = vpop.eup %3791 }
 0x6f5   : > { %v2372_v36 = vpop.f32.mrb[8].mxu1 }
 0x6f6   : > { %v2516_v37 = vadd.f32 %v2372_v36, %v2303_v25  ;;  %v3454_v38 = vpop.f32.mrb[9].mxu1 }
 0x6f7   : > { %v2375_v40 = vpop.f32.mrb[10].mxu1 }
 0x6f8   : > { %v2524_v41 = vmul.f32 %v3786_v39, %v2516_v37  ;;  %v2418_v42 = vpop.f32.mrb[20].mxu0  ;;  %v3455_v43 = vpop.f32.mrb[11].mxu1 }
 0x6f9   : > { %v2517_v44 = vadd.f32 %v2418_v42, %v2304_v28  ;;  %v3460_v45 = vpop.f32.mrb[21].mxu0 }
 0x6fa   : > { %v2421_v47 = vpop.f32.mrb[22].mxu0  ;;  %v3339_v45 = vld [vmem:[#allocation21] ss:$0 sm:$0xff] }
 0x6fb   : > { %v2525_v48 = vmul.f32 %v3788_v46, %v2517_v44  ;;  %v3461_v49 = vpop.f32.mrb[23].mxu0 }
 0x6fd   : > { %v2464_v50 = vpop.f32.mrb[12].mxu1 }
 0x6fe   : > { %v2518_v51 = vadd.f32 %v2464_v50, %v2305_v30  ;;  %v3466_v52 = vpop.f32.mrb[13].mxu1  ;;  %v3797_v50 = vld [vmem:[%s4973_s0] sm:$0xff] }
 0x6ff   : > { %v2467_v54 = vpop.f32.mrb[14].mxu1 }
 0x700   : > { %v2526_v55 = vmul.f32 %v3790_v53, %v2518_v51  ;;  %v3467_v56 = vpop.f32.mrb[15].mxu1 }
 0x701   : > { %v2510_v59 = vpop.f32.mrb[24].mxu0 }
 0x702   : > { %v2528_v60 = vcombine.low %v2524_v41, %v2526_v55  ;;  %v2529_v62 = vcombine.high %v2524_v41, %v2526_v55  ;;  %v2519_v1 = vadd.f32 %v2510_v59, %v2306_v34  ;;  %v3472_v0 = vpop.f32.mrb[25].mxu0 }
 0x703   : > { %v2513_v3 = vpop.f32.mrb[26].mxu0  ;;  %v3757_v0 = vld [vmem:[#allocation28] sm:$0xff]  }
 0x704   : > { %v2527_v4 = vmul.f32 %v3792_v57, %v2519_v1  ;;  %v3473_v5 = vpop.f32.mrb[27].mxu0  ;;  %v2536_v10 = vrot.slane %v2528_v60, %v5045_v2  ;;  %v2543_v11 = vrot.slane %v2529_v62, %v5045_v2  ;;  %v3755_v62 = vld [vmem:[#allocation25] sm:$0xff]   ;;  %v3756_v1 = vld [vmem:[#allocation25 + $0x8] sm:$0xff]  }
 0x705   : > { %3483 = vmatpush3.bf16.msra.mxu0 %v3755_v62  ;;  %v3758_v57 = vld [vmem:[#allocation28 + $0x8] sm:$0xff]   ;;  %v3759_v3 = vld [vmem:[#allocation28 + $0x10] sm:$0xff]  }
 0x706   : > { %v2544_v7 = vcombine.low %v2525_v48, %v2527_v4  ;;  %v2545_v8 = vcombine.high %v2525_v48, %v2527_v4  ;;  %3484 = vmatprep.subr.bf16.mxu0 %v4411_v13 }
 0x708   : > { %v2552_v19 = vrot.slane %v2544_v7, %v5045_v2  ;;  %v2559_v58 = vrot.slane %v2545_v8, %v5045_v2 }
 0x709   : > { %3485 = vmatpush3.bf16.msra.mxu0 %v3756_v1 }
 0x70a   : > { %v2560_v12 = vcombine.low %v2536_v10, %v2552_v19  ;;  %v2561_v14 = vcombine.high %v2536_v10, %v2552_v19  ;;  %v2576_v9 = vcombine.low %v2543_v11, %v2559_v58  ;;  %v2577_v15 = vcombine.high %v2543_v11, %v2559_v58  ;;  %v3343_v10 = vld [vmem:[#allocation22] ss:$0 sm:$0xff]  ;;  %v3344_v19 = vld [vmem:[#allocation24] ss:$0 sm:$0xff] }
 0x70c   : > { %v2568_v17 = vrot.slane %v2560_v12, %v5049_v6  ;;  %v2575_v18 = vrot.slane %v2561_v14, %v5049_v6  ;;  %v2584_v20 = vrot.slane %v2576_v9, %v5049_v6  ;;  %v2591_v21 = vrot.slane %v2577_v15, %v5049_v6  ;;  %v3760_v9 = vld [vmem:[#allocation28 + $0x18] sm:$0xff]   ;;  %v3761_v15 = vld [vmem:[#allocation28 + $0x20] sm:$0xff]  }
 0x70e   : > { %v2596_v22 = vcombine.low %v2568_v17, %v2575_v18  ;;  %v3337_v23 = vcombine.high %v2568_v17, %v2575_v18  ;;  %v2612_v24 = vcombine.low %v2584_v20, %v2591_v21  ;;  %v3338_v25 = vcombine.high %v2584_v20, %v2591_v21  ;;  %v3763_v17 = vld [vmem:[#allocation28 + $0x30] sm:$0xff]   ;;  %v3764_v18 = vld [vmem:[#allocation28 + $0x38] sm:$0xff]  }
 0x70f   : > { %v3345_v20 = vld [vmem:[#allocation27] ss:$0 sm:$0xff] }
 0x710   : > { %v2603_v26 = vrot.slane %v2596_v22, %v5045_v2  ;;  %v2611_v27 = vrot.slane %v3337_v23, %v5045_v2  ;;  %v2619_v28 = vrot.slane %v2612_v24, %v5045_v2  ;;  %v2627_v29 = vrot.slane %v3338_v25, %v5045_v2 }
 0x712   : > { %v2629_v61 = vcombine.high %v2603_v26, %v2611_v27  ;;  %v2645_v63 = vcombine.high %v2619_v28, %v2627_v29  ;;  %v2628_v30 = vcombine.low %v2603_v26, %v2611_v27  ;;  %v2644_v31 = vcombine.low %v2619_v28, %v2627_v29 }
 0x714   : > { %v2643_v32 = vrot.slane %v2629_v61, %v5049_v6  ;;  %v2659_v33 = vrot.slane %v2645_v63, %v5049_v6  ;;  %v2636_v34 = vrot.slane %v2628_v30, %v5049_v6  ;;  %v2652_v35 = vrot.slane %v2644_v31, %v5049_v6  ;;  %v3349_v30 = vld [vmem:[#allocation30] ss:$0 sm:$0xff] }
 0x716   : > { %v2662_v36 = vcombine.low %v2643_v32, %v2659_v33  ;;  %v2661_v37 = vcombine.high %v2636_v34, %v2652_v35  ;;  %v2663_v38 = vcombine.high %v2643_v32, %v2659_v33  ;;  %v2660_v39 = vcombine.low %v2636_v34, %v2652_v35 }
 0x718   : > { %2669 = vrot.lane.b32.xlu0 %v2662_v36, %s4420_s24  ;;  %2665 = vrot.lane.b32.xlu1 %v2661_v37, %s4421_s29  ;;  %s4280_s24 = sshll.u32 %s4423_s22, 4  ;;  %s4281_s24 = int_to_ptr.vmem [resolvable:$false] %s4280_s24 }
 0x719   : > { %s4282_s29 = scalar_lea.vmem %s4281_s24, 256  ;;  %p4283_p10 = scmp.lt.s32.totalorder %s5220_s28, %s4281_s24 }
 0x71a   : > { %p4284_p13 = scmp.lt.s32.totalorder %s4282_s29, %s4276_s1 }
 0x71c   : > { %2673 = vrot.lane.b32.xlu1 %v2663_v38, %s4422_s23  ;;  %p4285_p2 = por %p4284_p13, %p4283_p10 }
 0x71e   : > { %p4286_p8 = pnand %p4285_p2, %p4279_p7 }
 0x78a   : > { %v2666_v2 = vpop.permute.xlu1 %2665  ;;  %v2670_v40 = vpop.permute.xlu0 %2669 }
 0x78b   : > { %v2676_v41 = vsel %vm2078_vm3, %v2660_v39, %v2666_v2 }
 0x78c   : > { %v2678_v43 = vsel %vm2677_vm6, %v2676_v41, %v2670_v40 }
 0x78e   : > { %v2674_v42 = vpop.permute.xlu1 %2673 }
 0x78f   : > { %v2680_v6 = vsel %vm2679_vm7, %v2678_v43, %v2674_v42 }
 0x790   : > { %v2681_v44 = vpack.c.bf16 %v2680_v6, %v2680_v6 }
 0x792   : > { %3479 = vmatmul.mubr.msk.bf16.vlgmr.msra.gmra.mrb[16].mxu1 %vm798_vm0, %v2681_v44 }
 0x793   : > { %3506 = vmatprep.mubr.msk.bf16.mxu1 %vm4412_vm1, %v4411_v13  ;;  %3491 = vmatpush3.bf16.msra.mxu1 %v3757_v0 }
 0x794   : > { %3492 = vmatprep.subr.bf16.mxu1 %v4411_v13 }
 0x797   : > { %3493 = vmatpush3.bf16.msra.mxu1 %v3758_v57 }
 0x798   : > { %3494 = vmatprep.subr.bf16.mxu1 %v4411_v13 }
 0x79b   : > { %3495 = vmatpush3.bf16.msra.mxu1 %v3759_v3 }
 0x79c   : > { %3496 = vmatprep.subr.bf16.mxu1 %v4411_v13 }
 0x79f   : > { %3497 = vmatpush3.bf16.msra.mxu1 %v3760_v9 }
 0x7a0   : > { %3498 = vmatprep.subr.bf16.mxu1 %v4411_v13 }
 0x7a3   : > { %3499 = vmatpush3.bf16.msra.mxu1 %v3761_v15 }
 0x7a4   : > { %3500 = vmatprep.subr.bf16.mxu1 %v4411_v13 }
 0x7a7   : > { %3501 = vmatpush3.bf16.msra.mxu1 %v3762_v16 }
 0x7a8   : > { %3502 = vmatprep.subr.bf16.mxu1 %v4411_v13 }
 0x7ab   : > { %3503 = vmatpush3.bf16.msra.mxu1 %v3763_v17 }
 0x7ac   : > { %3504 = vmatprep.subr.bf16.mxu1 %v4411_v13 }
 0x7af   : > { %3505 = vmatpush3.bf16.msra.mxu1 %v3764_v18 }
 0x865   : > { %v2742_v46 = vpop.f32.mrb[16].mxu1 }
 0x866   : > { %v2743_v47 = vadd.f32 %v3339_v45, %v2742_v46  ;;  %v3480_v48 = vpop.f32.mrb[17].mxu1 }
 0x867   : > { %v2745_v49 = vpop.f32.mrb[18].mxu1 }
 0x868   : > { %v5196_v51 = vadd.f32 %v3797_v50, %v2743_v47  ;;  %v3481_v52 = vpop.f32.mrb[19].mxu1 }
 0x86a   : > { %v2751_v53 = vsel %vm798_vm0, %v5196_v51, 0.0 }
 0x86b   : > { %2752 = vadd.xlane.f32.xlu1 %v2751_v53 }
 0x8f8   : > { %v2753_v54 = vpop.xlane.xlu1 %2752 }
 0x8f9   : > { %v2754_v55 = vmul.f32 0.03125, %v2753_v54 }
 0x8fb   : > { %v2755_v56 = vsub.f32 %v5196_v51, %v2754_v55 }
 0x8fd   : > { %v2756_v59 = vmul.f32 %v2755_v56, %v2755_v56 }
 0x8ff   : > { %v2757_v60 = vsel %vm798_vm0, %v2756_v59, 0.0 }
 0x900   : > { %2758 = vadd.xlane.f32.xlu0 %v2757_v60 }
 0x98d   : > { %v2759_v4 = vpop.xlane.xlu0 %2758 }
 0x98e   : > { %v2760_v5 = vmul.f32 0.03125, %v2759_v4 }
 0x990   : > { %v2761_v7 = vadd.f32 1e-05, %v2760_v5 }
 0x992   : > { %3793 = vrsqrt.f32 %v2761_v7 }
 0x99c   : > { %v3794_v8 = vpop.eup %3793 }
 0x99d   : > { %v2763_v11 = vmul.f32 %v3794_v8, %v2755_v56 }
 0x99f   : > { %v2770_v58 = vmul.f32 %v3343_v10, %v2763_v11 }
 0x9a1   : > { %v2777_v12 = vadd.f32 %v3344_v19, %v2770_v58 }
 0x9a3   : > { %v2778_v14 = vpack.c.bf16 %v2777_v12, %v2777_v12 }
 0x9a5   : > { %3487 = vmatmul.mubr.msk.bf16.vlgmr.msra.gmra.mrb[28].mxu0 %vm798_vm0, %v2778_v14 }
 0xa78   : > { %v2839_v21 = vpop.f32.mrb[28].mxu0 }
 0xa79   : > { %v2840_v22 = vadd.f32 %v3345_v20, %v2839_v21  ;;  %v3488_v23 = vpop.f32.mrb[29].mxu0 }
 0xa7a   : > { %v2842_v24 = vpop.f32.mrb[30].mxu0 }
 0xa7b   : > { %v2846_v25 = vmul.f32 0.70710677, %v2840_v22  ;;  %v3489_v26 = vpop.f32.mrb[31].mxu0  ;;  %v2845_v28 = vmul.f32 0.5, %v2840_v22 }
 0xa7d   : > { %3795 = verf.f32 %v2846_v25 }
 0xa87   : > { %v3796_v27 = vpop.eup %3795 }
 0xa88   : > { %v2848_v29 = vadd.f32 1.0, %v3796_v27 }
 0xa8a   : > { %v2849_v61 = vmul.f32 %v2848_v29, %v2845_v28 }
 0xa8c   : > { %v2850_v63 = vpack.c.bf16 %v2849_v61, %v2849_v61 }
 0xa8e   : > { %3507 = vmatmul.mubr.bf16.vlgmr.msra.gmra.mrb[20].mxu1 %v2850_v63 }
 0xb61   : > { %v2956_v13 = vpop.f32.mrb[20].mxu1 }
 0xb62   : > { %v2957_v31 = vadd.f32 %v3349_v30, %v2956_v13  ;;  %v3508_v32 = vpop.f32.mrb[21].mxu1 }
 0xb63   : > { %v2959_v33 = vpop.f32.mrb[22].mxu1 }
 0xb64   : > { %v2962_v34 = vadd.f32 %v2957_v31, %v5196_v51  ;;  %v3509_v35 = vpop.f32.mrb[23].mxu1 }
 0xb66   : > { %2963 = vst.msk [vmem:[%s789_s18] sm:$0xff] %vm798_vm0, %v2962_v34 }
 0xb67   : > { %4289 = shalt.err (!%p4286_p8)
}
 0xb68   : > { %s4290_s30 = scalar_lea.hbm %s5218_s5, 128  ;;  %s4294_s17 = scalar_lea.hbm %s5349_s4, 256 }
 0xb69   : > { %p4291_p9 = scmp.ne.s32.totalorder %s5218_s5, %s4290_s30  ;;  %p4295_p3 = scmp.lt.u32.totalorder %s5218_s5, %s5349_s4 }
 0xb6a   : > { %p4296_p1 = scmp.lt.u32.totalorder %s4294_s17, %s4290_s30  ;;  %p4298_p11 = scmp.lt.u32.totalorder %s4290_s30, %s5218_s5 }
 0xb6b   : > { %p4292_p4 = pnand %p4291_p9, %p5350_p0 }
 0xb6c   : > { %p4297_p12 = por %p4296_p1, %p4295_p3 }
 0xb6d   : > { %p4293_p6 = pneg %p4292_p4 }
 0xb6e   : > { %p4299_p5 = por %p4298_p11, %p4297_p12 }
 0xb70   : > { %p4300_p7 = pnand %p4299_p5, %p4293_p6 }
 0xb72   : > { %4303 = shalt.err (!%p4300_p7)
}
 0xb73   : > { %3576 = dma.vmem_to_hbm [thread:$0]  (%p5350_p0), %s5220_s28, 128, %s5218_s5, %s2965_s3  }
 0xb74 PF: > { %s5351_s0 = sld [smem:[#allocation42_spill]]  ;;  %s5352_s1 = sld [smem:[#allocation47_spill]] }
 0xb75   : > { %p5353_p10 = scmp.ne.s32.totalorder %s5339_s21, 0 }
 0xb7a   : > { %s2991_s22 = sand.u32 1, %s5351_s0   ;;  %p5354_p13 = scmp.ge.s32.totalorder %s5352_s1, 2 }
 0xb7b   : > { %s2992_s24 = scalar_lea.sflag [#allocation6], %s2991_s22 }
 0xb7c   : > { %p3632_p2 = pnand %p5354_p13, %p5353_p10 }
 0xb7e   : > { %4365 = dma.done.wait (!%p3632_p2), %s2992_s24, 128  }
 0xb7f   : > { %4367 = vsyncadd (!%p3632_p2), %s2992_s24, 4294967168  ;;  %s41_s29 = sadd.s32 1, %s5352_s1   ;;  %s5355_s24 = sld [smem:[#allocation43_spill]] }
 0xb80   : > { %p38_p8 = scmp.ge.s32.totalorder %s41_s29, 4   ;;  %s5356_s25 = sld [smem:[#allocation44_spill]] }
 0xb81   : > { %s5357_s30 = sld [smem:[#allocation46_spill]]  ;;  %s5358_s26 = smov %s4917_s27 }
 0xb82   : > { %s5360_s28 = smov %s5362_s19  ;;  %40 = sbr.rel (!%p38_p8) target bundleno = 22 (0x16), region = 224 }
 0xb87   : > { %s5359_s27 = smov %s5357_s30 }
 0xb89   :  { %2997 = vsyncpa [#allocation5], 1 }
 0xb8a   :  { %2999 = vsyncpa [#allocation5 + $0x1], 1 }
 0xb8b   :  { %3000 = vsyncpa [#allocation8], 1 }
 0xb8c   :  { %3001 = vsyncpa [#allocation11], 1 }
 0xb8d   :  { %3002 = vsyncpa [#allocation14], 1 }
 0xb8e   :  { %3003 = vsyncpa [#allocation17], 1 }
 0xb8f   :  { %3004 = vsyncpa [#allocation20], 1 }
 0xb90   :  { %3005 = vsyncpa [#allocation23], 1 }
 0xb91   :  { %3006 = vsyncpa [#allocation26], 1 }
 0xb92   :  { %3007 = vsyncpa [#allocation29], 1 }
 0xb93   :  { %3008 = vsyncpa [#allocation6], 1 }
 0xb94   :  { %3010 = vsyncpa [#allocation6 + $0x1], 1 }

</bundles_post_ra>
